<compile_context>
chip_gen: v7x
topology: tpu7x:2x2x1
jax: 0.10.0
libtpu: 0.0.40
codegen_flags: <defaults>
</compile_context>

<pallas_src>
import jax
import jax.numpy as jnp
from jax.experimental import pallas as pl
from jax.experimental.pallas import tpu as pltpu

# ---------------- model hyper-parameters (small, deterministic) -------------
PATCH = 16
IMG = 32
CHANS = 3
D = 128          # embed dim            (384 in the real deit_small)
NH = 4           # num heads            (6   in the real deit_small)
HD = D // NH     # head dim
DEPTH = 2        # transformer blocks   (12  in the real deit_small)
MLP = 4 * D      # mlp hidden dim
NPATCH = (IMG // PATCH) ** 2
SEQ = NPATCH + 1
CPP = CHANS * PATCH * PATCH
LN_EPS = 1e-6
ATTN_SCALE = 1.0 / (HD ** 0.5)


# ----------------------------- in-kernel math --------------------------------
def _gelu(x):
    # TODO(synk): PyTorch nn.GELU uses exact erf-GELU; tanh approximation used
    # here for guaranteed Mosaic lowering (max abs diff ~1e-3).
    c = 0.7978845608028654  # sqrt(2/pi)
    return 0.5 * x * (1.0 + jnp.tanh(c * (x + 0.044715 * x * x * x)))


def _layernorm(x, g, b):
    mean = jnp.mean(x, axis=-1, keepdims=True)
    var = jnp.mean((x - mean) ** 2, axis=-1, keepdims=True)
    return (x - mean) * jax.lax.rsqrt(var + LN_EPS) * g + b


# ----------------------------- Pallas kernels --------------------------------
def _embed_kernel(patch_ref, pw_ref, pb_ref, cls_ref, pos_ref, o_ref):
    """Per-batch: patch matmul + bias, prepend cls token, add pos embed."""
    f32 = jnp.float32
    patches = patch_ref[...].astype(f32)                       # [NPATCH, CPP]
    tok = jnp.dot(patches, pw_ref[...].astype(f32),
                  preferred_element_type=f32) + pb_ref[...].astype(f32)
    pos = pos_ref[...].astype(f32)                              # [SEQ, D]
    cls_row = cls_ref[...].astype(f32) + pos[0:1, :]            # [1, D]
    o_ref[0:1, :] = cls_row.astype(o_ref.dtype)
    o_ref[1:SEQ, :] = (tok + pos[1:SEQ, :]).astype(o_ref.dtype)


def _block_kernel(x_ref, ln1_g, ln1_b, qkv_w, qkv_b, proj_w, proj_b,
                  ln2_g, ln2_b, fc1_w, fc1_b, fc2_w, fc2_b, o_ref):
    """One full transformer block for one batch element ([SEQ, D] tile)."""
    f32 = jnp.float32
    x = x_ref[...].astype(f32)                                  # [SEQ, D]

    # ---- attention sub-block: x = x + proj(attn(LN1(x))) ----
    h = _layernorm(x, ln1_g[...].astype(f32), ln1_b[...].astype(f32))
    qkv = jnp.dot(h, qkv_w[...].astype(f32),
                  preferred_element_type=f32) + qkv_b[...].astype(f32)  # [SEQ, 3D]
    pw = proj_w[...].astype(f32)                                # [D, D]

    acc = jnp.zeros((SEQ, D), f32)                              # lane-dense accumulator
    for hh in range(NH):                                        # unrolled head loop
        lo = hh * HD
        q = qkv[:, lo:lo + HD] * ATTN_SCALE                     # scale folded into q
        k = qkv[:, D + lo:D + lo + HD]
        v = qkv[:, 2 * D + lo:2 * D + lo + HD]
        s = jax.lax.dot_general(q, k, (((1,), (1,)), ((), ())),
                                preferred_element_type=f32)     # [SEQ, SEQ]
        m = jnp.max(s, axis=-1, keepdims=True)
        p = jnp.exp(s - m)
        p = p / jnp.sum(p, axis=-1, keepdims=True)
        oh = jnp.dot(p, v, preferred_element_type=f32)          # [SEQ, HD]
        # concat-free: project each head through its proj_w row-slice
        acc = acc + jnp.dot(oh, pw[lo:lo + HD, :], preferred_element_type=f32)
    x = x + acc + proj_b[...].astype(f32)

    # ---- mlp sub-block: x = x + fc2(gelu(fc1(LN2(x)))) ----
    h = _layernorm(x, ln2_g[...].astype(f32), ln2_b[...].astype(f32))
    h = jnp.dot(h, fc1_w[...].astype(f32),
                preferred_element_type=f32) + fc1_b[...].astype(f32)
    h = _gelu(h)
    h = jnp.dot(h, fc2_w[...].astype(f32),
                preferred_element_type=f32) + fc2_b[...].astype(f32)
    o_ref[...] = (x + h).astype(o_ref.dtype)


def _head_kernel(x_ref, g_ref, b_ref, w_ref, cb_ref, o_ref):
    """Final LN (on cls rows) + GELU head + classifier Linear(D, D)."""
    f32 = jnp.float32
    x = x_ref[...].astype(f32)                                  # [B, D] cls tokens
    h = _layernorm(x, g_ref[...].astype(f32), b_ref[...].astype(f32))
    h = _gelu(h)                                                # self.vit.head = nn.GELU()
    out = jnp.dot(h, w_ref[...].astype(f32),
                  preferred_element_type=f32) + cb_ref[...].astype(f32)
    # TODO(synk): Dropout(p=0.25) in the classifier is identity at inference.
    o_ref[...] = out.astype(o_ref.dtype)


# ------------------------------- wrappers -------------------------------------
def embed_tokens(patches, pw, pb, cls, pos):
    B = patches.shape[0]
    return pl.pallas_call(
        _embed_kernel,
        out_shape=jax.ShapeDtypeStruct((B, SEQ, D), patches.dtype),
        grid=(B,),
        in_specs=[
            pl.BlockSpec((None, NPATCH, CPP), lambda b: (b, 0, 0)),
            pl.BlockSpec((CPP, D), lambda b: (0, 0)),
            pl.BlockSpec((1, D), lambda b: (0, 0)),
            pl.BlockSpec((1, D), lambda b: (0, 0)),
            pl.BlockSpec((SEQ, D), lambda b: (0, 0)),
        ],
        out_specs=pl.BlockSpec((None, SEQ, D), lambda b: (b, 0, 0)),
        compiler_params=pltpu.CompilerParams(dimension_semantics=("parallel",)),
    )(patches, pw, pb.reshape(1, D), cls, pos)


def transformer_block(xs, blk):
    B = xs.shape[0]

    def rep(shape):
        return pl.BlockSpec(shape, lambda b: (0,) * len(shape))

    in_specs = [
        pl.BlockSpec((None, SEQ, D), lambda b: (b, 0, 0)),   # xs (per batch)
        rep((1, D)), rep((1, D)),                            # ln1 gamma/beta
        rep((D, 3 * D)), rep((1, 3 * D)),                    # qkv
        rep((D, D)), rep((1, D)),                            # proj
        rep((1, D)), rep((1, D)),                            # ln2 gamma/beta
        rep((D, MLP)), rep((1, MLP)),                        # fc1
        rep((MLP, D)), rep((1, D)),                          # fc2
    ]

    flops_per_batch = (2 * SEQ * D * 3 * D
                       + NH * (4 * SEQ * SEQ * HD + 2 * SEQ * HD * D)
                       + 4 * SEQ * D * MLP)
    weight_bytes = 4 * (D * 3 * D + 3 * D + D * D + D
                        + D * MLP + MLP + MLP * D + D + 4 * D)
    ce = pl.CostEstimate(
        flops=B * flops_per_batch,
        transcendentals=B * SEQ * (NH * SEQ + MLP),
        bytes_accessed=8 * B * SEQ * D + weight_bytes)

    return pl.pallas_call(
        _block_kernel,
        out_shape=jax.ShapeDtypeStruct(xs.shape, xs.dtype),
        grid=(B,),
        in_specs=in_specs,
        out_specs=pl.BlockSpec((None, SEQ, D), lambda b: (b, 0, 0)),
        compiler_params=pltpu.CompilerParams(dimension_semantics=("parallel",)),
        cost_estimate=ce,
    )(xs,
      blk["ln1_g"].reshape(1, D), blk["ln1_b"].reshape(1, D),
      blk["qkv_w"], blk["qkv_b"].reshape(1, 3 * D),
      blk["proj_w"], blk["proj_b"].reshape(1, D),
      blk["ln2_g"].reshape(1, D), blk["ln2_b"].reshape(1, D),
      blk["fc1_w"], blk["fc1_b"].reshape(1, MLP),
      blk["fc2_w"], blk["fc2_b"].reshape(1, D))


def head(cls_tokens, g, b, w, cb):
    B = cls_tokens.shape[0]
    return pl.pallas_call(
        _head_kernel,
        out_shape=jax.ShapeDtypeStruct((B, D), cls_tokens.dtype),
        grid=(1,),
        in_specs=[
            pl.BlockSpec((B, D), lambda i: (0, 0)),
            pl.BlockSpec((1, D), lambda i: (0, 0)),
            pl.BlockSpec((1, D), lambda i: (0, 0)),
            pl.BlockSpec((D, D), lambda i: (0, 0)),
            pl.BlockSpec((1, D), lambda i: (0, 0)),
        ],
        out_specs=pl.BlockSpec((B, D), lambda i: (0, 0)),
    )(cls_tokens, g.reshape(1, D), b.reshape(1, D), w, cb.reshape(1, D))


# --------------------------- parameter init ---------------------------------
def init_params(key):
    ks = iter(jax.random.split(key, 16 + DEPTH * 16))

    def dense(fan_in, fan_out):
        return jax.random.normal(next(ks), (fan_in, fan_out), jnp.float32) * 0.02

    params = {
        "patch_w": dense(CPP, D),                       # Conv2d(3,D,16,16) as matmul
        "patch_b": jnp.zeros((D,), jnp.float32),
        "cls_token": jax.random.normal(next(ks), (1, D), jnp.float32) * 0.02,
        "pos_embed": jax.random.normal(next(ks), (SEQ, D), jnp.float32) * 0.02,
        "lnf_g": jnp.ones((D,), jnp.float32),
        "lnf_b": jnp.zeros((D,), jnp.float32),
        "cls_w": dense(D, D),                           # classifier Linear(D, D)
        "cls_b": jnp.zeros((D,), jnp.float32),
        "blocks": [],
    }
    for _ in range(DEPTH):
        params["blocks"].append({
            "ln1_g": jnp.ones((D,), jnp.float32),
            "ln1_b": jnp.zeros((D,), jnp.float32),
            "qkv_w": dense(D, 3 * D),
            "qkv_b": jnp.zeros((3 * D,), jnp.float32),
            "proj_w": dense(D, D),
            "proj_b": jnp.zeros((D,), jnp.float32),
            "ln2_g": jnp.ones((D,), jnp.float32),
            "ln2_b": jnp.zeros((D,), jnp.float32),
            "fc1_w": dense(D, MLP),
            "fc1_b": jnp.zeros((MLP,), jnp.float32),
            "fc2_w": dense(MLP, D),
            "fc2_b": jnp.zeros((D,), jnp.float32),
        })
    return params


# ------------------------------ forward pass --------------------------------
def vit_forward(params, x):
    """x: [B, C, H, W] (NCHW, like PyTorch).  Returns [B, D]."""
    B, C, H, W = x.shape
    Hp, Wp = H // PATCH, W // PATCH

    # Patch unfold (Conv2d k=16 s=16 == unfold + matmul).
    # TODO(synk): NCHW->patch unfold stays an XLA transpose (24 KB here); could
    # be folded into a strided BlockSpec index_map at real deit_small sizes.
    patches = (x.reshape(B, C, Hp, PATCH, Wp, PATCH)
                 .transpose(0, 2, 4, 1, 3, 5)
                 .reshape(B, Hp * Wp, CPP))

    # Fused: patch matmul + cls token + pos embed  -> [B, SEQ, D]
    xs = embed_tokens(patches, params["patch_w"], params["patch_b"],
                      params["cls_token"], params["pos_embed"])

    # One fused pallas_call per transformer block (grid over batch, parallel).
    for blk in params["blocks"]:
        xs = transformer_block(xs, blk)

    # cls tokens -> fused final LN + GELU head + classifier linear.
    cls_tokens = xs[:, 0, :]                               # [B, D]
    return head(cls_tokens, params["lnf_g"], params["lnf_b"],
                params["cls_w"], params["cls_b"])


# --------------------------------- main --------------------------------------
if __name__ == "__main__":
    key = jax.random.PRNGKey(0)
    pkey, xkey = jax.random.split(key)

    params = init_params(pkey)
    x = jax.random.normal(xkey, (2, CHANS, IMG, IMG), jnp.float32)   # NCHW

    out = jax.jit(vit_forward)(params, x)
    out = jax.block_until_ready(out)

    assert out.shape == (2, D) and out.dtype == jnp.float32
    assert bool(jnp.all(jnp.isfinite(out)))
    print("KERNEL_OK")
</pallas_src>

<mosaic_0001>
module attributes {stable_mosaic.version = 11 : i64} {
  func.func @_embed_kernel(%arg0: i32, %arg1: memref<1x4x768xf32, #tpu.memory_space<vmem>>, %arg2: memref<768x128xf32, #tpu.memory_space<vmem>>, %arg3: memref<1x128xf32, #tpu.memory_space<vmem>>, %arg4: memref<1x128xf32, #tpu.memory_space<vmem>>, %arg5: memref<5x128xf32, #tpu.memory_space<vmem>>, %arg6: memref<1x5x128xf32, #tpu.memory_space<vmem>>) attributes {dimension_semantics = [#tpu.dimension_semantics<parallel>], iteration_bounds = array<i64: 2>, scalar_prefetch = 0 : i64, scratch_operands = 0 : i64, tpu.core_type = #tpu.core_type<tc>, window_params = [{transform_indices = @transform_0, window_bounds = array<i64: 1, 4, 768>}, {pipeline_mode = #tpu.pipeline_mode<synchronous>, transform_indices = @transform_1, window_bounds = array<i64: 768, 128>}, {pipeline_mode = #tpu.pipeline_mode<synchronous>, transform_indices = @transform_2, window_bounds = array<i64: 1, 128>}, {pipeline_mode = #tpu.pipeline_mode<synchronous>, transform_indices = @transform_3, window_bounds = array<i64: 1, 128>}, {pipeline_mode = #tpu.pipeline_mode<synchronous>, transform_indices = @transform_4, window_bounds = array<i64: 5, 128>}, {transform_indices = @transform_5, window_bounds = array<i64: 1, 5, 128>}]} {
    %c0 = arith.constant 0 : index
    %c0_0 = arith.constant 0 : index
    %c0_1 = arith.constant 0 : index
    %0 = vector.load %arg1[%c0, %c0_0, %c0_1] : memref<1x4x768xf32, #tpu.memory_space<vmem>>, vector<1x4x768xf32>
    %1 = vector.shape_cast %0 : vector<1x4x768xf32> to vector<4x768xf32>
    %c0_2 = arith.constant 0 : index
    %c0_3 = arith.constant 0 : index
    %2 = vector.load %arg2[%c0_2, %c0_3] : memref<768x128xf32, #tpu.memory_space<vmem>>, vector<768x128xf32>
    %cst = arith.constant dense<0.000000e+00> : vector<4x128xf32>
    %3 = tpu.matmul %1, %2, %cst {dimension_numbers = #tpu.dot_dimension_numbers<[1], [0], [0], [1], [0, 0, 1, 1], [], []>} : vector<4x768xf32>, vector<768x128xf32>, vector<4x128xf32> -> vector<4x128xf32>
    %c0_4 = arith.constant 0 : index
    %c0_5 = arith.constant 0 : index
    %4 = vector.load %arg3[%c0_4, %c0_5] : memref<1x128xf32, #tpu.memory_space<vmem>>, vector<1x128xf32>
    %5 = vector.broadcast %4 : vector<1x128xf32> to vector<4x128xf32>
    %6 = arith.addf %3, %5 : vector<4x128xf32>
    %c0_6 = arith.constant 0 : index
    %c0_7 = arith.constant 0 : index
    %7 = vector.load %arg5[%c0_6, %c0_7] : memref<5x128xf32, #tpu.memory_space<vmem>>, vector<5x128xf32>
    %c0_8 = arith.constant 0 : index
    %c0_9 = arith.constant 0 : index
    %8 = vector.load %arg4[%c0_8, %c0_9] : memref<1x128xf32, #tpu.memory_space<vmem>>, vector<1x128xf32>
    %9 = vector.extract_strided_slice %7 {offsets = [0, 0], sizes = [1, 128], strides = [1, 1]} : vector<5x128xf32> to vector<1x128xf32>
    %10 = arith.addf %8, %9 : vector<1x128xf32>
    %c0_10 = arith.constant 0 : index
    %c0_11 = arith.constant 0 : index
    %c0_12 = arith.constant 0 : index
    %11 = vector.load %arg6[%c0_10, %c0_11, %c0_12] : memref<1x5x128xf32, #tpu.memory_space<vmem>>, vector<1x1x128xf32>
    %12 = vector.shape_cast %11 : vector<1x1x128xf32> to vector<1x128xf32>
    %13 = vector.shape_cast %10 : vector<1x128xf32> to vector<1x1x128xf32>
    tpu.vector_store %arg6[%c0_10, %c0_11, %c0_12], %13 {strides = array<i32>} : memref<1x5x128xf32, #tpu.memory_space<vmem>>, vector<1x1x128xf32>,
    %14 = vector.extract_strided_slice %7 {offsets = [1, 0], sizes = [4, 128], strides = [1, 1]} : vector<5x128xf32> to vector<4x128xf32>
    %15 = arith.addf %6, %14 : vector<4x128xf32>
    %c0_13 = arith.constant 0 : index
    %c1 = arith.constant 1 : index
    %c0_14 = arith.constant 0 : index
    %16 = vector.load %arg6[%c0_13, %c1, %c0_14] : memref<1x5x128xf32, #tpu.memory_space<vmem>>, vector<1x4x128xf32>
    %17 = vector.shape_cast %16 : vector<1x4x128xf32> to vector<4x128xf32>
    %18 = vector.shape_cast %15 : vector<4x128xf32> to vector<1x4x128xf32>
    tpu.vector_store %arg6[%c0_13, %c1, %c0_14], %18 {strides = array<i32>} : memref<1x5x128xf32, #tpu.memory_space<vmem>>, vector<1x4x128xf32>,
    return
  }
  func.func @transform_0(%arg0: i32) -> (i32, i32, i32) {
    %c0_i32 = arith.constant 0 : i32
    %c0_i32_0 = arith.constant 0 : i32
    %c0_i32_1 = arith.constant 0 : i32
    return %arg0, %c0_i32, %c0_i32_0 : i32, i32, i32
  }
  func.func @transform_1(%arg0: i32) -> (i32, i32) {
    %c0_i32 = arith.constant 0 : i32
    %c0_i32_0 = arith.constant 0 : i32
    %c0_i32_1 = arith.constant 0 : i32
    return %c0_i32, %c0_i32_0 : i32, i32
  }
  func.func @transform_2(%arg0: i32) -> (i32, i32) {
    %c0_i32 = arith.constant 0 : i32
    %c0_i32_0 = arith.constant 0 : i32
    %c0_i32_1 = arith.constant 0 : i32
    return %c0_i32, %c0_i32_0 : i32, i32
  }
  func.func @transform_3(%arg0: i32) -> (i32, i32) {
    %c0_i32 = arith.constant 0 : i32
    %c0_i32_0 = arith.constant 0 : i32
    %c0_i32_1 = arith.constant 0 : i32
    return %c0_i32, %c0_i32_0 : i32, i32
  }
  func.func @transform_4(%arg0: i32) -> (i32, i32) {
    %c0_i32 = arith.constant 0 : i32
    %c0_i32_0 = arith.constant 0 : i32
    %c0_i32_1 = arith.constant 0 : i32
    return %c0_i32, %c0_i32_0 : i32, i32
  }
  func.func @transform_5(%arg0: i32) -> (i32, i32, i32) {
    %c0_i32 = arith.constant 0 : i32
    %c0_i32_0 = arith.constant 0 : i32
    %c0_i32_1 = arith.constant 0 : i32
    return %arg0, %c0_i32, %c0_i32_0 : i32, i32, i32
  }
}

module attributes {stable_mosaic.version = 11 : i64} {
  func.func @_block_kernel(%arg0: i32, %arg1: memref<1x5x128xf32, #tpu.memory_space<vmem>>, %arg2: memref<1x128xf32, #tpu.memory_space<vmem>>, %arg3: memref<1x128xf32, #tpu.memory_space<vmem>>, %arg4: memref<128x384xf32, #tpu.memory_space<vmem>>, %arg5: memref<1x384xf32, #tpu.memory_space<vmem>>, %arg6: memref<128x128xf32, #tpu.memory_space<vmem>>, %arg7: memref<1x128xf32, #tpu.memory_space<vmem>>, %arg8: memref<1x128xf32, #tpu.memory_space<vmem>>, %arg9: memref<1x128xf32, #tpu.memory_space<vmem>>, %arg10: memref<128x512xf32, #tpu.memory_space<vmem>>, %arg11: memref<1x512xf32, #tpu.memory_space<vmem>>, %arg12: memref<512x128xf32, #tpu.memory_space<vmem>>, %arg13: memref<1x128xf32, #tpu.memory_space<vmem>>, %arg14: memref<1x5x128xf32, #tpu.memory_space<vmem>>) attributes {dimension_semantics = [#tpu.dimension_semantics<parallel>], iteration_bounds = array<i64: 2>, scalar_prefetch = 0 : i64, scratch_operands = 0 : i64, tpu.core_type = #tpu.core_type<tc>, window_params = [{transform_indices = @transform_0, window_bounds = array<i64: 1, 5, 128>}, {pipeline_mode = #tpu.pipeline_mode<synchronous>, transform_indices = @transform_1, window_bounds = array<i64: 1, 128>}, {pipeline_mode = #tpu.pipeline_mode<synchronous>, transform_indices = @transform_2, window_bounds = array<i64: 1, 128>}, {pipeline_mode = #tpu.pipeline_mode<synchronous>, transform_indices = @transform_3, window_bounds = array<i64: 128, 384>}, {pipeline_mode = #tpu.pipeline_mode<synchronous>, transform_indices = @transform_4, window_bounds = array<i64: 1, 384>}, {pipeline_mode = #tpu.pipeline_mode<synchronous>, transform_indices = @transform_5, window_bounds = array<i64: 128, 128>}, {pipeline_mode = #tpu.pipeline_mode<synchronous>, transform_indices = @transform_6, window_bounds = array<i64: 1, 128>}, {pipeline_mode = #tpu.pipeline_mode<synchronous>, transform_indices = @transform_7, window_bounds = array<i64: 1, 128>}, {pipeline_mode = #tpu.pipeline_mode<synchronous>, transform_indices = @transform_8, window_bounds = array<i64: 1, 128>}, {pipeline_mode = #tpu.pipeline_mode<synchronous>, transform_indices = @transform_9, window_bounds = array<i64: 128, 512>}, {pipeline_mode = #tpu.pipeline_mode<synchronous>, transform_indices = @transform_10, window_bounds = array<i64: 1, 512>}, {pipeline_mode = #tpu.pipeline_mode<synchronous>, transform_indices = @transform_11, window_bounds = array<i64: 512, 128>}, {pipeline_mode = #tpu.pipeline_mode<synchronous>, transform_indices = @transform_12, window_bounds = array<i64: 1, 128>}, {transform_indices = @transform_13, window_bounds = array<i64: 1, 5, 128>}]} {
    %c0 = arith.constant 0 : index
    %c0_0 = arith.constant 0 : index
    %c0_1 = arith.constant 0 : index
    %0 = vector.load %arg1[%c0, %c0_0, %c0_1] : memref<1x5x128xf32, #tpu.memory_space<vmem>>, vector<1x5x128xf32>
    %1 = vector.shape_cast %0 : vector<1x5x128xf32> to vector<5x128xf32>
    %c0_2 = arith.constant 0 : index
    %c0_3 = arith.constant 0 : index
    %2 = vector.load %arg2[%c0_2, %c0_3] : memref<1x128xf32, #tpu.memory_space<vmem>>, vector<1x128xf32>
    %c0_4 = arith.constant 0 : index
    %c0_5 = arith.constant 0 : index
    %3 = vector.load %arg3[%c0_4, %c0_5] : memref<1x128xf32, #tpu.memory_space<vmem>>, vector<1x128xf32>
    %cst = arith.constant dense<0.000000e+00> : vector<5xf32>
    %4 = vector.multi_reduction <add>, %1, %cst [1] : vector<5x128xf32> to vector<5xf32>
    %5 = vector.shape_cast %4 : vector<5xf32> to vector<5x1xf32>
    %cst_6 = arith.constant 1.280000e+02 : f32
    %6 = vector.broadcast %cst_6 : f32 to vector<5x1xf32>
    %7 = arith.divf %5, %6 : vector<5x1xf32>
    %8 = vector.broadcast %7 : vector<5x1xf32> to vector<5x128xf32>
    %9 = arith.subf %1, %8 : vector<5x128xf32>
    %10 = arith.mulf %9, %9 : vector<5x128xf32>
    %cst_7 = arith.constant dense<0.000000e+00> : vector<5xf32>
    %11 = vector.multi_reduction <add>, %10, %cst_7 [1] : vector<5x128xf32> to vector<5xf32>
    %12 = vector.shape_cast %11 : vector<5xf32> to vector<5x1xf32>
    %cst_8 = arith.constant 1.280000e+02 : f32
    %13 = vector.broadcast %cst_8 : f32 to vector<5x1xf32>
    %14 = arith.divf %12, %13 : vector<5x1xf32>
    %15 = vector.broadcast %7 : vector<5x1xf32> to vector<5x128xf32>
    %16 = arith.subf %1, %15 : vector<5x128xf32>
    %cst_9 = arith.constant 9.99999997E-7 : f32
    %17 = vector.broadcast %cst_9 : f32 to vector<5x1xf32>
    %18 = arith.addf %14, %17 : vector<5x1xf32>
    %19 = math.rsqrt %18 : vector<5x1xf32>
    %20 = vector.broadcast %19 : vector<5x1xf32> to vector<5x128xf32>
    %21 = arith.mulf %16, %20 : vector<5x128xf32>
    %22 = vector.broadcast %2 : vector<1x128xf32> to vector<5x128xf32>
    %23 = arith.mulf %21, %22 : vector<5x128xf32>
    %24 = vector.broadcast %3 : vector<1x128xf32> to vector<5x128xf32>
    %25 = arith.addf %23, %24 : vector<5x128xf32>
    %c0_10 = arith.constant 0 : index
    %c0_11 = arith.constant 0 : index
    %26 = vector.load %arg4[%c0_10, %c0_11] : memref<128x384xf32, #tpu.memory_space<vmem>>, vector<128x384xf32>
    %cst_12 = arith.constant dense<0.000000e+00> : vector<5x384xf32>
    %27 = tpu.matmul %25, %26, %cst_12 {dimension_numbers = #tpu.dot_dimension_numbers<[1], [0], [0], [1], [0, 0, 1, 1], [], []>} : vector<5x128xf32>, vector<128x384xf32>, vector<5x384xf32> -> vector<5x384xf32>
    %c0_13 = arith.constant 0 : index
    %c0_14 = arith.constant 0 : index
    %28 = vector.load %arg5[%c0_13, %c0_14] : memref<1x384xf32, #tpu.memory_space<vmem>>, vector<1x384xf32>
    %29 = vector.broadcast %28 : vector<1x384xf32> to vector<5x384xf32>
    %30 = arith.addf %27, %29 : vector<5x384xf32>
    %c0_15 = arith.constant 0 : index
    %c0_16 = arith.constant 0 : index
    %31 = vector.load %arg6[%c0_15, %c0_16] : memref<128x128xf32, #tpu.memory_space<vmem>>, vector<128x128xf32>
    %cst_17 = arith.constant 0.000000e+00 : f32
    %32 = vector.broadcast %cst_17 : f32 to vector<5x128xf32>
    %33 = vector.extract_strided_slice %30 {offsets = [0, 0], sizes = [5, 32], strides = [1, 1]} : vector<5x384xf32> to vector<5x32xf32>
    %cst_18 = arith.constant 0.176776692 : f32
    %34 = vector.broadcast %cst_18 : f32 to vector<5x32xf32>
    %35 = arith.mulf %33, %34 : vector<5x32xf32>
    %36 = vector.extract_strided_slice %30 {offsets = [0, 128], sizes = [5, 32], strides = [1, 1]} : vector<5x384xf32> to vector<5x32xf32>
    %37 = vector.extract_strided_slice %30 {offsets = [0, 256], sizes = [5, 32], strides = [1, 1]} : vector<5x384xf32> to vector<5x32xf32>
    %cst_19 = arith.constant dense<0.000000e+00> : vector<5x5xf32>
    %38 = tpu.matmul %35, %36, %cst_19 {dimension_numbers = #tpu.dot_dimension_numbers<[1], [1], [0], [0], [0, 0, 1, 0], [], []>} : vector<5x32xf32>, vector<5x32xf32>, vector<5x5xf32> -> vector<5x5xf32>
    %cst_20 = arith.constant dense<0xFF800000> : vector<5xf32>
    %39 = vector.multi_reduction <maximumf>, %38, %cst_20 [1] : vector<5x5xf32> to vector<5xf32>
    %40 = vector.shape_cast %39 : vector<5xf32> to vector<5x1xf32>
    %41 = vector.broadcast %40 : vector<5x1xf32> to vector<5x5xf32>
    %42 = arith.subf %38, %41 : vector<5x5xf32>
    %43 = math.exp %42 : vector<5x5xf32>
    %cst_21 = arith.constant dense<0.000000e+00> : vector<5xf32>
    %44 = vector.multi_reduction <add>, %43, %cst_21 [1] : vector<5x5xf32> to vector<5xf32>
    %45 = vector.shape_cast %44 : vector<5xf32> to vector<5x1xf32>
    %46 = vector.broadcast %45 : vector<5x1xf32> to vector<5x5xf32>
    %47 = arith.divf %43, %46 : vector<5x5xf32>
    %cst_22 = arith.constant dense<0.000000e+00> : vector<5x32xf32>
    %48 = tpu.matmul %47, %37, %cst_22 {dimension_numbers = #tpu.dot_dimension_numbers<[1], [0], [0], [1], [0, 0, 1, 1], [], []>} : vector<5x5xf32>, vector<5x32xf32>, vector<5x32xf32> -> vector<5x32xf32>
    %49 = vector.extract_strided_slice %31 {offsets = [0, 0], sizes = [32, 128], strides = [1, 1]} : vector<128x128xf32> to vector<32x128xf32>
    %cst_23 = arith.constant dense<0.000000e+00> : vector<5x128xf32>
    %50 = tpu.matmul %48, %49, %cst_23 {dimension_numbers = #tpu.dot_dimension_numbers<[1], [0], [0], [1], [0, 0, 1, 1], [], []>} : vector<5x32xf32>, vector<32x128xf32>, vector<5x128xf32> -> vector<5x128xf32>
    %51 = arith.addf %32, %50 : vector<5x128xf32>
    %52 = vector.extract_strided_slice %30 {offsets = [0, 32], sizes = [5, 32], strides = [1, 1]} : vector<5x384xf32> to vector<5x32xf32>
    %cst_24 = arith.constant 0.176776692 : f32
    %53 = vector.broadcast %cst_24 : f32 to vector<5x32xf32>
    %54 = arith.mulf %52, %53 : vector<5x32xf32>
    %55 = vector.extract_strided_slice %30 {offsets = [0, 160], sizes = [5, 32], strides = [1, 1]} : vector<5x384xf32> to vector<5x32xf32>
    %56 = vector.extract_strided_slice %30 {offsets = [0, 288], sizes = [5, 32], strides = [1, 1]} : vector<5x384xf32> to vector<5x32xf32>
    %cst_25 = arith.constant dense<0.000000e+00> : vector<5x5xf32>
    %57 = tpu.matmul %54, %55, %cst_25 {dimension_numbers = #tpu.dot_dimension_numbers<[1], [1], [0], [0], [0, 0, 1, 0], [], []>} : vector<5x32xf32>, vector<5x32xf32>, vector<5x5xf32> -> vector<5x5xf32>
    %cst_26 = arith.constant dense<0xFF800000> : vector<5xf32>
    %58 = vector.multi_reduction <maximumf>, %57, %cst_26 [1] : vector<5x5xf32> to vector<5xf32>
    %59 = vector.shape_cast %58 : vector<5xf32> to vector<5x1xf32>
    %60 = vector.broadcast %59 : vector<5x1xf32> to vector<5x5xf32>
    %61 = arith.subf %57, %60 : vector<5x5xf32>
    %62 = math.exp %61 : vector<5x5xf32>
    %cst_27 = arith.constant dense<0.000000e+00> : vector<5xf32>
    %63 = vector.multi_reduction <add>, %62, %cst_27 [1] : vector<5x5xf32> to vector<5xf32>
    %64 = vector.shape_cast %63 : vector<5xf32> to vector<5x1xf32>
    %65 = vector.broadcast %64 : vector<5x1xf32> to vector<5x5xf32>
    %66 = arith.divf %62, %65 : vector<5x5xf32>
    %cst_28 = arith.constant dense<0.000000e+00> : vector<5x32xf32>
    %67 = tpu.matmul %66, %56, %cst_28 {dimension_numbers = #tpu.dot_dimension_numbers<[1], [0], [0], [1], [0, 0, 1, 1], [], []>} : vector<5x5xf32>, vector<5x32xf32>, vector<5x32xf32> -> vector<5x32xf32>
    %68 = vector.extract_strided_slice %31 {offsets = [32, 0], sizes = [32, 128], strides = [1, 1]} : vector<128x128xf32> to vector<32x128xf32>
    %cst_29 = arith.constant dense<0.000000e+00> : vector<5x128xf32>
    %69 = tpu.matmul %67, %68, %cst_29 {dimension_numbers = #tpu.dot_dimension_numbers<[1], [0], [0], [1], [0, 0, 1, 1], [], []>} : vector<5x32xf32>, vector<32x128xf32>, vector<5x128xf32> -> vector<5x128xf32>
    %70 = arith.addf %51, %69 : vector<5x128xf32>
    %71 = vector.extract_strided_slice %30 {offsets = [0, 64], sizes = [5, 32], strides = [1, 1]} : vector<5x384xf32> to vector<5x32xf32>
    %cst_30 = arith.constant 0.176776692 : f32
    %72 = vector.broadcast %cst_30 : f32 to vector<5x32xf32>
    %73 = arith.mulf %71, %72 : vector<5x32xf32>
    %74 = vector.extract_strided_slice %30 {offsets = [0, 192], sizes = [5, 32], strides = [1, 1]} : vector<5x384xf32> to vector<5x32xf32>
    %75 = vector.extract_strided_slice %30 {offsets = [0, 320], sizes = [5, 32], strides = [1, 1]} : vector<5x384xf32> to vector<5x32xf32>
    %cst_31 = arith.constant dense<0.000000e+00> : vector<5x5xf32>
    %76 = tpu.matmul %73, %74, %cst_31 {dimension_numbers = #tpu.dot_dimension_numbers<[1], [1], [0], [0], [0, 0, 1, 0], [], []>} : vector<5x32xf32>, vector<5x32xf32>, vector<5x5xf32> -> vector<5x5xf32>
    %cst_32 = arith.constant dense<0xFF800000> : vector<5xf32>
    %77 = vector.multi_reduction <maximumf>, %76, %cst_32 [1] : vector<5x5xf32> to vector<5xf32>
    %78 = vector.shape_cast %77 : vector<5xf32> to vector<5x1xf32>
    %79 = vector.broadcast %78 : vector<5x1xf32> to vector<5x5xf32>
    %80 = arith.subf %76, %79 : vector<5x5xf32>
    %81 = math.exp %80 : vector<5x5xf32>
    %cst_33 = arith.constant dense<0.000000e+00> : vector<5xf32>
    %82 = vector.multi_reduction <add>, %81, %cst_33 [1] : vector<5x5xf32> to vector<5xf32>
    %83 = vector.shape_cast %82 : vector<5xf32> to vector<5x1xf32>
    %84 = vector.broadcast %83 : vector<5x1xf32> to vector<5x5xf32>
    %85 = arith.divf %81, %84 : vector<5x5xf32>
    %cst_34 = arith.constant dense<0.000000e+00> : vector<5x32xf32>
    %86 = tpu.matmul %85, %75, %cst_34 {dimension_numbers = #tpu.dot_dimension_numbers<[1], [0], [0], [1], [0, 0, 1, 1], [], []>} : vector<5x5xf32>, vector<5x32xf32>, vector<5x32xf32> -> vector<5x32xf32>
    %87 = vector.extract_strided_slice %31 {offsets = [64, 0], sizes = [32, 128], strides = [1, 1]} : vector<128x128xf32> to vector<32x128xf32>
    %cst_35 = arith.constant dense<0.000000e+00> : vector<5x128xf32>
    %88 = tpu.matmul %86, %87, %cst_35 {dimension_numbers = #tpu.dot_dimension_numbers<[1], [0], [0], [1], [0, 0, 1, 1], [], []>} : vector<5x32xf32>, vector<32x128xf32>, vector<5x128xf32> -> vector<5x128xf32>
    %89 = arith.addf %70, %88 : vector<5x128xf32>
    %90 = vector.extract_strided_slice %30 {offsets = [0, 96], sizes = [5, 32], strides = [1, 1]} : vector<5x384xf32> to vector<5x32xf32>
    %cst_36 = arith.constant 0.176776692 : f32
    %91 = vector.broadcast %cst_36 : f32 to vector<5x32xf32>
    %92 = arith.mulf %90, %91 : vector<5x32xf32>
    %93 = vector.extract_strided_slice %30 {offsets = [0, 224], sizes = [5, 32], strides = [1, 1]} : vector<5x384xf32> to vector<5x32xf32>
    %94 = vector.extract_strided_slice %30 {offsets = [0, 352], sizes = [5, 32], strides = [1, 1]} : vector<5x384xf32> to vector<5x32xf32>
    %cst_37 = arith.constant dense<0.000000e+00> : vector<5x5xf32>
    %95 = tpu.matmul %92, %93, %cst_37 {dimension_numbers = #tpu.dot_dimension_numbers<[1], [1], [0], [0], [0, 0, 1, 0], [], []>} : vector<5x32xf32>, vector<5x32xf32>, vector<5x5xf32> -> vector<5x5xf32>
    %cst_38 = arith.constant dense<0xFF800000> : vector<5xf32>
    %96 = vector.multi_reduction <maximumf>, %95, %cst_38 [1] : vector<5x5xf32> to vector<5xf32>
    %97 = vector.shape_cast %96 : vector<5xf32> to vector<5x1xf32>
    %98 = vector.broadcast %97 : vector<5x1xf32> to vector<5x5xf32>
    %99 = arith.subf %95, %98 : vector<5x5xf32>
    %100 = math.exp %99 : vector<5x5xf32>
    %cst_39 = arith.constant dense<0.000000e+00> : vector<5xf32>
    %101 = vector.multi_reduction <add>, %100, %cst_39 [1] : vector<5x5xf32> to vector<5xf32>
    %102 = vector.shape_cast %101 : vector<5xf32> to vector<5x1xf32>
    %103 = vector.broadcast %102 : vector<5x1xf32> to vector<5x5xf32>
    %104 = arith.divf %100, %103 : vector<5x5xf32>
    %cst_40 = arith.constant dense<0.000000e+00> : vector<5x32xf32>
    %105 = tpu.matmul %104, %94, %cst_40 {dimension_numbers = #tpu.dot_dimension_numbers<[1], [0], [0], [1], [0, 0, 1, 1], [], []>} : vector<5x5xf32>, vector<5x32xf32>, vector<5x32xf32> -> vector<5x32xf32>
    %106 = vector.extract_strided_slice %31 {offsets = [96, 0], sizes = [32, 128], strides = [1, 1]} : vector<128x128xf32> to vector<32x128xf32>
    %cst_41 = arith.constant dense<0.000000e+00> : vector<5x128xf32>
    %107 = tpu.matmul %105, %106, %cst_41 {dimension_numbers = #tpu.dot_dimension_numbers<[1], [0], [0], [1], [0, 0, 1, 1], [], []>} : vector<5x32xf32>, vector<32x128xf32>, vector<5x128xf32> -> vector<5x128xf32>
    %108 = arith.addf %89, %107 : vector<5x128xf32>
    %109 = arith.addf %1, %108 : vector<5x128xf32>
    %c0_42 = arith.constant 0 : index
    %c0_43 = arith.constant 0 : index
    %110 = vector.load %arg7[%c0_42, %c0_43] : memref<1x128xf32, #tpu.memory_space<vmem>>, vector<1x128xf32>
    %111 = vector.broadcast %110 : vector<1x128xf32> to vector<5x128xf32>
    %112 = arith.addf %109, %111 : vector<5x128xf32>
    %c0_44 = arith.constant 0 : index
    %c0_45 = arith.constant 0 : index
    %113 = vector.load %arg8[%c0_44, %c0_45] : memref<1x128xf32, #tpu.memory_space<vmem>>, vector<1x128xf32>
    %c0_46 = arith.constant 0 : index
    %c0_47 = arith.constant 0 : index
    %114 = vector.load %arg9[%c0_46, %c0_47] : memref<1x128xf32, #tpu.memory_space<vmem>>, vector<1x128xf32>
    %cst_48 = arith.constant dense<0.000000e+00> : vector<5xf32>
    %115 = vector.multi_reduction <add>, %112, %cst_48 [1] : vector<5x128xf32> to vector<5xf32>
    %116 = vector.shape_cast %115 : vector<5xf32> to vector<5x1xf32>
    %cst_49 = arith.constant 1.280000e+02 : f32
    %117 = vector.broadcast %cst_49 : f32 to vector<5x1xf32>
    %118 = arith.divf %116, %117 : vector<5x1xf32>
    %119 = vector.broadcast %118 : vector<5x1xf32> to vector<5x128xf32>
    %120 = arith.subf %112, %119 : vector<5x128xf32>
    %121 = arith.mulf %120, %120 : vector<5x128xf32>
    %cst_50 = arith.constant dense<0.000000e+00> : vector<5xf32>
    %122 = vector.multi_reduction <add>, %121, %cst_50 [1] : vector<5x128xf32> to vector<5xf32>
    %123 = vector.shape_cast %122 : vector<5xf32> to vector<5x1xf32>
    %cst_51 = arith.constant 1.280000e+02 : f32
    %124 = vector.broadcast %cst_51 : f32 to vector<5x1xf32>
    %125 = arith.divf %123, %124 : vector<5x1xf32>
    %126 = vector.broadcast %118 : vector<5x1xf32> to vector<5x128xf32>
    %127 = arith.subf %112, %126 : vector<5x128xf32>
    %cst_52 = arith.constant 9.99999997E-7 : f32
    %128 = vector.broadcast %cst_52 : f32 to vector<5x1xf32>
    %129 = arith.addf %125, %128 : vector<5x1xf32>
    %130 = math.rsqrt %129 : vector<5x1xf32>
    %131 = vector.broadcast %130 : vector<5x1xf32> to vector<5x128xf32>
    %132 = arith.mulf %127, %131 : vector<5x128xf32>
    %133 = vector.broadcast %113 : vector<1x128xf32> to vector<5x128xf32>
    %134 = arith.mulf %132, %133 : vector<5x128xf32>
    %135 = vector.broadcast %114 : vector<1x128xf32> to vector<5x128xf32>
    %136 = arith.addf %134, %135 : vector<5x128xf32>
    %c0_53 = arith.constant 0 : index
    %c0_54 = arith.constant 0 : index
    %137 = vector.load %arg10[%c0_53, %c0_54] : memref<128x512xf32, #tpu.memory_space<vmem>>, vector<128x512xf32>
    %cst_55 = arith.constant dense<0.000000e+00> : vector<5x512xf32>
    %138 = tpu.matmul %136, %137, %cst_55 {dimension_numbers = #tpu.dot_dimension_numbers<[1], [0], [0], [1], [0, 0, 1, 1], [], []>} : vector<5x128xf32>, vector<128x512xf32>, vector<5x512xf32> -> vector<5x512xf32>
    %c0_56 = arith.constant 0 : index
    %c0_57 = arith.constant 0 : index
    %139 = vector.load %arg11[%c0_56, %c0_57] : memref<1x512xf32, #tpu.memory_space<vmem>>, vector<1x512xf32>
    %140 = vector.broadcast %139 : vector<1x512xf32> to vector<5x512xf32>
    %141 = arith.addf %138, %140 : vector<5x512xf32>
    %cst_58 = arith.constant 5.000000e-01 : f32
    %142 = vector.broadcast %cst_58 : f32 to vector<5x512xf32>
    %143 = arith.mulf %142, %141 : vector<5x512xf32>
    %cst_59 = arith.constant 4.471500e-02 : f32
    %144 = vector.broadcast %cst_59 : f32 to vector<5x512xf32>
    %145 = arith.mulf %144, %141 : vector<5x512xf32>
    %146 = arith.mulf %145, %141 : vector<5x512xf32>
    %147 = arith.mulf %146, %141 : vector<5x512xf32>
    %148 = arith.addf %141, %147 : vector<5x512xf32>
    %cst_60 = arith.constant 0.797884583 : f32
    %149 = vector.broadcast %cst_60 : f32 to vector<5x512xf32>
    %150 = arith.mulf %149, %148 : vector<5x512xf32>
    %151 = math.tanh %150 : vector<5x512xf32>
    %cst_61 = arith.constant 1.000000e+00 : f32
    %152 = vector.broadcast %cst_61 : f32 to vector<5x512xf32>
    %153 = arith.addf %152, %151 : vector<5x512xf32>
    %154 = arith.mulf %143, %153 : vector<5x512xf32>
    %c0_62 = arith.constant 0 : index
    %c0_63 = arith.constant 0 : index
    %155 = vector.load %arg12[%c0_62, %c0_63] : memref<512x128xf32, #tpu.memory_space<vmem>>, vector<512x128xf32>
    %cst_64 = arith.constant dense<0.000000e+00> : vector<5x128xf32>
    %156 = tpu.matmul %154, %155, %cst_64 {dimension_numbers = #tpu.dot_dimension_numbers<[1], [0], [0], [1], [0, 0, 1, 1], [], []>} : vector<5x512xf32>, vector<512x128xf32>, vector<5x128xf32> -> vector<5x128xf32>
    %c0_65 = arith.constant 0 : index
    %c0_66 = arith.constant 0 : index
    %157 = vector.load %arg13[%c0_65, %c0_66] : memref<1x128xf32, #tpu.memory_space<vmem>>, vector<1x128xf32>
    %158 = vector.broadcast %157 : vector<1x128xf32> to vector<5x128xf32>
    %159 = arith.addf %156, %158 : vector<5x128xf32>
    %160 = arith.addf %112, %159 : vector<5x128xf32>
    %c0_67 = arith.constant 0 : index
    %c0_68 = arith.constant 0 : index
    %c0_69 = arith.constant 0 : index
    %161 = vector.load %arg14[%c0_67, %c0_68, %c0_69] : memref<1x5x128xf32, #tpu.memory_space<vmem>>, vector<1x5x128xf32>
    %162 = vector.shape_cast %161 : vector<1x5x128xf32> to vector<5x128xf32>
    %163 = vector.shape_cast %160 : vector<5x128xf32> to vector<1x5x128xf32>
    tpu.vector_store %arg14[%c0_67, %c0_68, %c0_69], %163 {strides = array<i32>} : memref<1x5x128xf32, #tpu.memory_space<vmem>>, vector<1x5x128xf32>,
    return
  }
  func.func @transform_0(%arg0: i32) -> (i32, i32, i32) {
    %c0_i32 = arith.constant 0 : i32
    %c0_i32_0 = arith.constant 0 : i32
    %c0_i32_1 = arith.constant 0 : i32
    return %arg0, %c0_i32, %c0_i32_0 : i32, i32, i32
  }
  func.func @transform_1(%arg0: i32) -> (i32, i32) {
    %c0_i32 = arith.constant 0 : i32
    %c0_i32_0 = arith.constant 0 : i32
    %c0_i32_1 = arith.constant 0 : i32
    return %c0_i32, %c0_i32_0 : i32, i32
  }
  func.func @transform_2(%arg0: i32) -> (i32, i32) {
    %c0_i32 = arith.constant 0 : i32
    %c0_i32_0 = arith.constant 0 : i32
    %c0_i32_1 = arith.constant 0 : i32
    return %c0_i32, %c0_i32_0 : i32, i32
  }
  func.func @transform_3(%arg0: i32) -> (i32, i32) {
    %c0_i32 = arith.constant 0 : i32
    %c0_i32_0 = arith.constant 0 : i32
    %c0_i32_1 = arith.constant 0 : i32
    return %c0_i32, %c0_i32_0 : i32, i32
  }
  func.func @transform_4(%arg0: i32) -> (i32, i32) {
    %c0_i32 = arith.constant 0 : i32
    %c0_i32_0 = arith.constant 0 : i32
    %c0_i32_1 = arith.constant 0 : i32
    return %c0_i32, %c0_i32_0 : i32, i32
  }
  func.func @transform_5(%arg0: i32) -> (i32, i32) {
    %c0_i32 = arith.constant 0 : i32
    %c0_i32_0 = arith.constant 0 : i32
    %c0_i32_1 = arith.constant 0 : i32
    return %c0_i32, %c0_i32_0 : i32, i32
  }
  func.func @transform_6(%arg0: i32) -> (i32, i32) {
    %c0_i32 = arith.constant 0 : i32
    %c0_i32_0 = arith.constant 0 : i32
    %c0_i32_1 = arith.constant 0 : i32
    return %c0_i32, %c0_i32_0 : i32, i32
  }
  func.func @transform_7(%arg0: i32) -> (i32, i32) {
    %c0_i32 = arith.constant 0 : i32
    %c0_i32_0 = arith.constant 0 : i32
    %c0_i32_1 = arith.constant 0 : i32
    return %c0_i32, %c0_i32_0 : i32, i32
  }
  func.func @transform_8(%arg0: i32) -> (i32, i32) {
    %c0_i32 = arith.constant 0 : i32
    %c0_i32_0 = arith.constant 0 : i32
    %c0_i32_1 = arith.constant 0 : i32
    return %c0_i32, %c0_i32_0 : i32, i32
  }
  func.func @transform_9(%arg0: i32) -> (i32, i32) {
    %c0_i32 = arith.constant 0 : i32
    %c0_i32_0 = arith.constant 0 : i32
    %c0_i32_1 = arith.constant 0 : i32
    return %c0_i32, %c0_i32_0 : i32, i32
  }
  func.func @transform_10(%arg0: i32) -> (i32, i32) {
    %c0_i32 = arith.constant 0 : i32
    %c0_i32_0 = arith.constant 0 : i32
    %c0_i32_1 = arith.constant 0 : i32
    return %c0_i32, %c0_i32_0 : i32, i32
  }
  func.func @transform_11(%arg0: i32) -> (i32, i32) {
    %c0_i32 = arith.constant 0 : i32
    %c0_i32_0 = arith.constant 0 : i32
    %c0_i32_1 = arith.constant 0 : i32
    return %c0_i32, %c0_i32_0 : i32, i32
  }
  func.func @transform_12(%arg0: i32) -> (i32, i32) {
    %c0_i32 = arith.constant 0 : i32
    %c0_i32_0 = arith.constant 0 : i32
    %c0_i32_1 = arith.constant 0 : i32
    return %c0_i32, %c0_i32_0 : i32, i32
  }
  func.func @transform_13(%arg0: i32) -> (i32, i32, i32) {
    %c0_i32 = arith.constant 0 : i32
    %c0_i32_0 = arith.constant 0 : i32
    %c0_i32_1 = arith.constant 0 : i32
    return %arg0, %c0_i32, %c0_i32_0 : i32, i32, i32
  }
}

module attributes {stable_mosaic.version = 11 : i64} {
  func.func @_head_kernel(%arg0: i32, %arg1: memref<2x128xf32, #tpu.memory_space<vmem>>, %arg2: memref<1x128xf32, #tpu.memory_space<vmem>>, %arg3: memref<1x128xf32, #tpu.memory_space<vmem>>, %arg4: memref<128x128xf32, #tpu.memory_space<vmem>>, %arg5: memref<1x128xf32, #tpu.memory_space<vmem>>, %arg6: memref<2x128xf32, #tpu.memory_space<vmem>>) attributes {dimension_semantics = [#tpu.dimension_semantics<arbitrary>], iteration_bounds = array<i64: 1>, scalar_prefetch = 0 : i64, scratch_operands = 0 : i64, tpu.core_type = #tpu.core_type<tc>, window_params = [{pipeline_mode = #tpu.pipeline_mode<synchronous>, transform_indices = @transform_0, window_bounds = array<i64: 2, 128>}, {pipeline_mode = #tpu.pipeline_mode<synchronous>, transform_indices = @transform_1, window_bounds = array<i64: 1, 128>}, {pipeline_mode = #tpu.pipeline_mode<synchronous>, transform_indices = @transform_2, window_bounds = array<i64: 1, 128>}, {pipeline_mode = #tpu.pipeline_mode<synchronous>, transform_indices = @transform_3, window_bounds = array<i64: 128, 128>}, {pipeline_mode = #tpu.pipeline_mode<synchronous>, transform_indices = @transform_4, window_bounds = array<i64: 1, 128>}, {pipeline_mode = #tpu.pipeline_mode<synchronous>, transform_indices = @transform_5, window_bounds = array<i64: 2, 128>}]} {
    %c0 = arith.constant 0 : index
    %c0_0 = arith.constant 0 : index
    %0 = vector.load %arg1[%c0, %c0_0] : memref<2x128xf32, #tpu.memory_space<vmem>>, vector<2x128xf32>
    %c0_1 = arith.constant 0 : index
    %c0_2 = arith.constant 0 : index
    %1 = vector.load %arg2[%c0_1, %c0_2] : memref<1x128xf32, #tpu.memory_space<vmem>>, vector<1x128xf32>
    %c0_3 = arith.constant 0 : index
    %c0_4 = arith.constant 0 : index
    %2 = vector.load %arg3[%c0_3, %c0_4] : memref<1x128xf32, #tpu.memory_space<vmem>>, vector<1x128xf32>
    %cst = arith.constant dense<0.000000e+00> : vector<2xf32>
    %3 = vector.multi_reduction <add>, %0, %cst [1] : vector<2x128xf32> to vector<2xf32>
    %4 = vector.shape_cast %3 : vector<2xf32> to vector<2x1xf32>
    %cst_5 = arith.constant 1.280000e+02 : f32
    %5 = vector.broadcast %cst_5 : f32 to vector<2x1xf32>
    %6 = arith.divf %4, %5 : vector<2x1xf32>
    %7 = vector.broadcast %6 : vector<2x1xf32> to vector<2x128xf32>
    %8 = arith.subf %0, %7 : vector<2x128xf32>
    %9 = arith.mulf %8, %8 : vector<2x128xf32>
    %cst_6 = arith.constant dense<0.000000e+00> : vector<2xf32>
    %10 = vector.multi_reduction <add>, %9, %cst_6 [1] : vector<2x128xf32> to vector<2xf32>
    %11 = vector.shape_cast %10 : vector<2xf32> to vector<2x1xf32>
    %cst_7 = arith.constant 1.280000e+02 : f32
    %12 = vector.broadcast %cst_7 : f32 to vector<2x1xf32>
    %13 = arith.divf %11, %12 : vector<2x1xf32>
    %14 = vector.broadcast %6 : vector<2x1xf32> to vector<2x128xf32>
    %15 = arith.subf %0, %14 : vector<2x128xf32>
    %cst_8 = arith.constant 9.99999997E-7 : f32
    %16 = vector.broadcast %cst_8 : f32 to vector<2x1xf32>
    %17 = arith.addf %13, %16 : vector<2x1xf32>
    %18 = math.rsqrt %17 : vector<2x1xf32>
    %19 = vector.broadcast %18 : vector<2x1xf32> to vector<2x128xf32>
    %20 = arith.mulf %15, %19 : vector<2x128xf32>
    %21 = vector.broadcast %1 : vector<1x128xf32> to vector<2x128xf32>
    %22 = arith.mulf %20, %21 : vector<2x128xf32>
    %23 = vector.broadcast %2 : vector<1x128xf32> to vector<2x128xf32>
    %24 = arith.addf %22, %23 : vector<2x128xf32>
    %cst_9 = arith.constant 5.000000e-01 : f32
    %25 = vector.broadcast %cst_9 : f32 to vector<2x128xf32>
    %26 = arith.mulf %25, %24 : vector<2x128xf32>
    %cst_10 = arith.constant 4.471500e-02 : f32
    %27 = vector.broadcast %cst_10 : f32 to vector<2x128xf32>
    %28 = arith.mulf %27, %24 : vector<2x128xf32>
    %29 = arith.mulf %28, %24 : vector<2x128xf32>
    %30 = arith.mulf %29, %24 : vector<2x128xf32>
    %31 = arith.addf %24, %30 : vector<2x128xf32>
    %cst_11 = arith.constant 0.797884583 : f32
    %32 = vector.broadcast %cst_11 : f32 to vector<2x128xf32>
    %33 = arith.mulf %32, %31 : vector<2x128xf32>
    %34 = math.tanh %33 : vector<2x128xf32>
    %cst_12 = arith.constant 1.000000e+00 : f32
    %35 = vector.broadcast %cst_12 : f32 to vector<2x128xf32>
    %36 = arith.addf %35, %34 : vector<2x128xf32>
    %37 = arith.mulf %26, %36 : vector<2x128xf32>
    %c0_13 = arith.constant 0 : index
    %c0_14 = arith.constant 0 : index
    %38 = vector.load %arg4[%c0_13, %c0_14] : memref<128x128xf32, #tpu.memory_space<vmem>>, vector<128x128xf32>
    %cst_15 = arith.constant dense<0.000000e+00> : vector<2x128xf32>
    %39 = tpu.matmul %37, %38, %cst_15 {dimension_numbers = #tpu.dot_dimension_numbers<[1], [0], [0], [1], [0, 0, 1, 1], [], []>} : vector<2x128xf32>, vector<128x128xf32>, vector<2x128xf32> -> vector<2x128xf32>
    %c0_16 = arith.constant 0 : index
    %c0_17 = arith.constant 0 : index
    %40 = vector.load %arg5[%c0_16, %c0_17] : memref<1x128xf32, #tpu.memory_space<vmem>>, vector<1x128xf32>
    %41 = vector.broadcast %40 : vector<1x128xf32> to vector<2x128xf32>
    %42 = arith.addf %39, %41 : vector<2x128xf32>
    %c0_18 = arith.constant 0 : index
    %c0_19 = arith.constant 0 : index
    %43 = vector.load %arg6[%c0_18, %c0_19] : memref<2x128xf32, #tpu.memory_space<vmem>>, vector<2x128xf32>
    tpu.vector_store %arg6[%c0_18, %c0_19], %42 {strides = array<i32>} : memref<2x128xf32, #tpu.memory_space<vmem>>, vector<2x128xf32>,
    return
  }
  func.func @transform_0(%arg0: i32) -> (i32, i32) {
    %c0_i32 = arith.constant 0 : i32
    %c0_i32_0 = arith.constant 0 : i32
    %c0_i32_1 = arith.constant 0 : i32
    return %c0_i32, %c0_i32_0 : i32, i32
  }
  func.func @transform_1(%arg0: i32) -> (i32, i32) {
    %c0_i32 = arith.constant 0 : i32
    %c0_i32_0 = arith.constant 0 : i32
    %c0_i32_1 = arith.constant 0 : i32
    return %c0_i32, %c0_i32_0 : i32, i32
  }
  func.func @transform_2(%arg0: i32) -> (i32, i32) {
    %c0_i32 = arith.constant 0 : i32
    %c0_i32_0 = arith.constant 0 : i32
    %c0_i32_1 = arith.constant 0 : i32
    return %c0_i32, %c0_i32_0 : i32, i32
  }
  func.func @transform_3(%arg0: i32) -> (i32, i32) {
    %c0_i32 = arith.constant 0 : i32
    %c0_i32_0 = arith.constant 0 : i32
    %c0_i32_1 = arith.constant 0 : i32
    return %c0_i32, %c0_i32_0 : i32, i32
  }
  func.func @transform_4(%arg0: i32) -> (i32, i32) {
    %c0_i32 = arith.constant 0 : i32
    %c0_i32_0 = arith.constant 0 : i32
    %c0_i32_1 = arith.constant 0 : i32
    return %c0_i32, %c0_i32_0 : i32, i32
  }
  func.func @transform_5(%arg0: i32) -> (i32, i32) {
    %c0_i32 = arith.constant 0 : i32
    %c0_i32_0 = arith.constant 0 : i32
    %c0_i32_1 = arith.constant 0 : i32
    return %c0_i32, %c0_i32_0 : i32, i32
  }
}

</mosaic_0001>

<bundles_post_ra>
// kernel: vit_forward.4
= control target key start
LH: loop header
LB: loop body
LE: loop exit
PB: predicated region body
PF: predicated region fallthrough
CT: control target
= control target key end

     0   :  { %s871_s18 = smov 0   ;;  %s1204_s0 = inlined_call_operand.vmem [shape: f32[2,4,768], index: 0, kind: input, shape index: {}]   ;;  %s1205_s1 = inlined_call_operand.vmem [shape: f32[768,128], index: 1, kind: input, shape index: {}]   ;;  %s1206_s2 = inlined_call_operand.vmem [shape: f32[1,128], index: 2, kind: input, shape index: {}]   ;;  %s1207_s3 = inlined_call_operand.vmem [shape: f32[1,128], index: 3, kind: input, shape index: {}]   ;;  %s1208_s4 = inlined_call_operand.vmem [shape: f32[5,128], index: 4, kind: input, shape index: {}]   ;;  %s1209_s5 = inlined_call_operand.vmem [shape: f32[2,5,128], index: 5, kind: output, shape index: {}]  }
   0x1 LB: > { %s610_s19 = sadd.s32 4294967295, %s839_s18   ;;  %p614_p0 = scmp.ge.s32.totalorder %s839_s18, 1  ;;  %s839_s18 = sphi %s871_s18, %s15_s18  }
   0x2   : > { %p187_p1 = scmp.lt.s32.totalorder %s839_s18, 3 }
   0x4   : > { %p188_p2 = pnand %p614_p0, %p187_p1 }
   0x5   : > { %v242_v0 = vld [vmem:[%s1205_s1 + $0x80] sm:$0xff] (!%p188_p2)  ;;  %v243_v1 = vld [vmem:[%s1205_s1 + $0x88] sm:$0xff] (!%p188_p2)  ;;  %v244_v11 = vld [vmem:[%s1205_s1 + $0x90] sm:$0xff] (!%p188_p2)  ;;  %p935_p3 = scmp.lt.s32.totalorder (!%p188_p2), %s610_s19, 1 }
   0x6   : > { %191 = sbr.rel (%p188_p2) target bundleno = 292 (0x124), region = 40  ;;  %v226_v2 = vld [vmem:[%s1205_s1] sm:$0xff] (!%p188_p2)  ;;  %v725_v3 = vpack.c.bf16 (!%p188_p2), %v243_v1, %v242_v0  ;;  %v227_v4 = vld [vmem:[%s1205_s1 + $0x8] sm:$0xff] (!%p188_p2)  ;;  %v245_v13 = vld [vmem:[%s1205_s1 + $0x98] sm:$0xff] (!%p188_p2) }
   0x7   : > { %v274_v5 = vld [vmem:[%s1205_s1 + $0x180] sm:$0xff] (!%p188_p2)  ;;  %v275_v6 = vld [vmem:[%s1205_s1 + $0x188] sm:$0xff] (!%p188_p2)  ;;  %v727_v7 = vpack.c.bf16 (!%p188_p2), %v227_v4, %v226_v2  ;;  %v228_v14 = vld [vmem:[%s1205_s1 + $0x10] sm:$0xff] (!%p188_p2)  ;;  %v729_v16 = vpack.c.bf16 (!%p188_p2), %v245_v13, %v244_v11 }
   0x8   : > { %v757_v8 = vpack.c.bf16 (!%p188_p2), %v275_v6, %v274_v5  ;;  %v258_v9 = vld [vmem:[%s1205_s1 + $0x100] sm:$0xff] (!%p188_p2)  ;;  %v259_v10 = vld [vmem:[%s1205_s1 + $0x108] sm:$0xff] (!%p188_p2)  ;;  %726 = vmatprep.subr.bf16.mxu0 (!%p188_p2), %v725_v3  ;;  %v229_v15 = vld [vmem:[%s1205_s1 + $0x18] sm:$0xff] (!%p188_p2) }
   0x9   : > { %v759_v12 = vpack.c.bf16 (!%p188_p2), %v259_v10, %v258_v9  ;;  %728 = vmatpush3.bf16.msra.mxu0 (!%p188_p2), %v727_v7  ;;  %v731_v17 = vpack.c.bf16 (!%p188_p2), %v229_v15, %v228_v14  ;;  %v276_v18 = vld [vmem:[%s1205_s1 + $0x190] sm:$0xff] (!%p188_p2)  ;;  %v277_v19 = vld [vmem:[%s1205_s1 + $0x198] sm:$0xff] (!%p188_p2)  ;;  %v246_v23 = vld [vmem:[%s1205_s1 + $0xa0] sm:$0xff] (!%p188_p2) }
   0xa   : > { %758 = vmatprep.subr.bf16.mxu1 (!%p188_p2), %v757_v8  ;;  %v260_v20 = vld [vmem:[%s1205_s1 + $0x110] sm:$0xff] (!%p188_p2)  ;;  %v761_v21 = vpack.c.bf16 (!%p188_p2), %v277_v19, %v276_v18  ;;  %v261_v22 = vld [vmem:[%s1205_s1 + $0x118] sm:$0xff] (!%p188_p2)  ;;  %v247_v24 = vld [vmem:[%s1205_s1 + $0xa8] sm:$0xff] (!%p188_p2)  ;;  %730 = vmatprep.subr.bf16.mxu0 (!%p188_p2), %v729_v16 }
   0xb   : > { %760 = vmatpush3.bf16.msra.mxu1 (!%p188_p2), %v759_v12  ;;  %v763_v25 = vpack.c.bf16 (!%p188_p2), %v261_v22, %v260_v20  ;;  %v733_v26 = vpack.c.bf16 (!%p188_p2), %v247_v24, %v246_v23  ;;  %v230_v27 = vld [vmem:[%s1205_s1 + $0x20] sm:$0xff] (!%p188_p2)  ;;  %v231_v28 = vld [vmem:[%s1205_s1 + $0x28] sm:$0xff] (!%p188_p2)  ;;  %v248_v35 = vld [vmem:[%s1205_s1 + $0xb0] sm:$0xff] (!%p188_p2) }
   0xc   : > { %v278_v29 = vld [vmem:[%s1205_s1 + $0x1a0] sm:$0xff] (!%p188_p2)  ;;  %762 = vmatprep.subr.bf16.mxu1 (!%p188_p2), %v761_v21  ;;  %v279_v30 = vld [vmem:[%s1205_s1 + $0x1a8] sm:$0xff] (!%p188_p2)  ;;  %v735_v33 = vpack.c.bf16 (!%p188_p2), %v231_v28, %v230_v27  ;;  %v249_v36 = vld [vmem:[%s1205_s1 + $0xb8] sm:$0xff] (!%p188_p2) }
   0xd   : > { %v262_v31 = vld [vmem:[%s1205_s1 + $0x120] sm:$0xff]  ;;  %v263_v32 = vld [vmem:[%s1205_s1 + $0x128] sm:$0xff]  ;;  %732 = vmatpush3.bf16.msra.mxu0 %v731_v17  ;;  %v765_v34 = vpack.c.bf16 %v279_v30, %v278_v29  ;;  %v232_v37 = vld [vmem:[%s1205_s1 + $0x30] sm:$0xff]  ;;  %v737_v39 = vpack.c.bf16 %v249_v36, %v248_v35  ;;  %s1212_s19 = smov (!%p935_p3, %s610_s19), 1 }
   0xe   : > { %734 = vmatprep.subr.bf16.mxu0 %v733_v26  ;;  %v767_v38 = vpack.c.bf16 %v263_v32, %v262_v31  ;;  %v233_v40 = vld [vmem:[%s1205_s1 + $0x38] sm:$0xff]  ;;  %v280_v41 = vld [vmem:[%s1205_s1 + $0x1b0] sm:$0xff]  ;;  %v250_v46 = vld [vmem:[%s1205_s1 + $0xc0] sm:$0xff]  ;;  %s821_s30 = smul.u32 24, %s1212_s19 }
   0xf   : > { %764 = vmatpush3.bf16.msra.mxu1 %v763_v25  ;;  %v281_v42 = vld [vmem:[%s1205_s1 + $0x1b8] sm:$0xff]  ;;  %v264_v44 = vld [vmem:[%s1205_s1 + $0x130] sm:$0xff]  ;;  %v251_v47 = vld [vmem:[%s1205_s1 + $0xc8] sm:$0xff]  ;;  %v739_v48 = vpack.c.bf16 %v233_v40, %v232_v37 }
  0x10   : > { %766 = vmatprep.subr.bf16.mxu1 %v765_v34  ;;  %v769_v43 = vpack.c.bf16 %v281_v42, %v280_v41  ;;  %v265_v45 = vld [vmem:[%s1205_s1 + $0x138] sm:$0xff]  ;;  %v282_v49 = vld [vmem:[%s1205_s1 + $0x1c0] sm:$0xff]  ;;  %v283_v50 = vld [vmem:[%s1205_s1 + $0x1c8] sm:$0xff]  ;;  %v741_v52 = vpack.c.bf16 %v251_v47, %v250_v46  ;;  %s1036_s26 = scalar_lea.vmem %s1204_s0, %s821_s30  ;;  %s616_s30 = sshll.u32 %s1212_s19, 3 }
  0x11   : > { %736 = vmatpush3.bf16.msra.mxu0 %v735_v33  ;;  %v771_v51 = vpack.c.bf16 %v265_v45, %v264_v44  ;;  %v234_v53 = vld [vmem:[%s1205_s1 + $0x40] sm:$0xff]  ;;  %v235_v54 = vld [vmem:[%s1205_s1 + $0x48] sm:$0xff]  ;;  %v773_v56 = vpack.c.bf16 %v283_v50, %v282_v49  ;;  %v252_v58 = vld [vmem:[%s1205_s1 + $0xd0] sm:$0xff]  ;;  %s222_s13 = scalar_lea.vmem %s1209_s5, %s616_s30 }
  0x12   : > { %738 = vmatprep.subr.bf16.mxu0 %v737_v39  ;;  %v266_v55 = vld [vmem:[%s1205_s1 + $0x140] sm:$0xff]  ;;  %v267_v57 = vld [vmem:[%s1205_s1 + $0x148] sm:$0xff]  ;;  %v253_v59 = vld [vmem:[%s1205_s1 + $0xd8] sm:$0xff]  ;;  %v743_v62 = vpack.c.bf16 %v235_v54, %v234_v53 }
  0x13   : > { %768 = vmatpush3.bf16.msra.mxu1 %v767_v38  ;;  %v284_v60 = vld [vmem:[%s1205_s1 + $0x1d0] sm:$0xff]  ;;  %v285_v61 = vld [vmem:[%s1205_s1 + $0x1d8] sm:$0xff]  ;;  %v775_v63 = vpack.c.bf16 %v267_v57, %v266_v55  ;;  %v745_v0 = vpack.c.bf16 %v253_v59, %v252_v58  ;;  %v254_v6 = vld [vmem:[%s1205_s1 + $0xe0] sm:$0xff] }
  0x14   : > { %770 = vmatprep.subr.bf16.mxu1 %v769_v43  ;;  %v236_v1 = vld [vmem:[%s1205_s1 + $0x50] sm:$0xff]  ;;  %v237_v2 = vld [vmem:[%s1205_s1 + $0x58] sm:$0xff]  ;;  %v777_v4 = vpack.c.bf16 %v285_v61, %v284_v60  ;;  %v255_v7 = vld [vmem:[%s1205_s1 + $0xe8] sm:$0xff] }
  0x15   : > { %740 = vmatpush3.bf16.msra.mxu0 %v739_v48  ;;  %v268_v3 = vld [vmem:[%s1205_s1 + $0x150] sm:$0xff]  ;;  %v269_v5 = vld [vmem:[%s1205_s1 + $0x158] sm:$0xff]  ;;  %v286_v8 = vld [vmem:[%s1205_s1 + $0x1e0] sm:$0xff]  ;;  %v747_v10 = vpack.c.bf16 %v237_v2, %v236_v1  ;;  %v749_v14 = vpack.c.bf16 %v255_v7, %v254_v6 }
  0x16   : > { %742 = vmatprep.subr.bf16.mxu0 %v741_v52  ;;  %v287_v9 = vld [vmem:[%s1205_s1 + $0x1e8] sm:$0xff]  ;;  %v238_v11 = vld [vmem:[%s1205_s1 + $0x60] sm:$0xff]  ;;  %v779_v13 = vpack.c.bf16 %v269_v5, %v268_v3  ;;  %v256_v20 = vld [vmem:[%s1205_s1 + $0xf0] sm:$0xff] }
  0x17   : > { %772 = vmatpush3.bf16.msra.mxu1 %v771_v51  ;;  %v223_v12 = vld [vmem:[%s1036_s26] sm:$0xff]  ;;  %v239_v15 = vld [vmem:[%s1205_s1 + $0x68] sm:$0xff]  ;;  %v781_v19 = vpack.c.bf16 %v287_v9, %v286_v8  ;;  %v257_v21 = vld [vmem:[%s1205_s1 + $0xf8] sm:$0xff] }
  0x18   : > { %774 = vmatprep.subr.bf16.mxu1 %v773_v56  ;;  %v270_v16 = vld [vmem:[%s1205_s1 + $0x160] sm:$0xff]  ;;  %v271_v17 = vld [vmem:[%s1205_s1 + $0x168] sm:$0xff]  ;;  %v332_v18 = vcombine.high %v223_v12, %v223_v12  ;;  %v288_v23 = vld [vmem:[%s1205_s1 + $0x1f0] sm:$0xff]  ;;  %v751_v26 = vpack.c.bf16 %v239_v15, %v238_v11  ;;  %v753_v28 = vpack.c.bf16 %v257_v21, %v256_v20 }
  0x19   : > { %744 = vmatpush3.bf16.msra.mxu0 %v743_v62  ;;  %v224_v22 = vld [vmem:[%s1036_s26 + $0x8] sm:$0xff]  ;;  %v289_v24 = vld [vmem:[%s1205_s1 + $0x1f8] sm:$0xff]  ;;  %v783_v27 = vpack.c.bf16 %v271_v17, %v270_v16  ;;  %v240_v29 = vld [vmem:[%s1205_s1 + $0x70] sm:$0xff] }
  0x1a   : > { %746 = vmatprep.subr.bf16.mxu0 %v745_v0  ;;  %402 = vmatprep.mubr.f32.mxu0 %v332_v18  ;;  %v333_v25 = vcombine.high %v224_v22, %v224_v22  ;;  %v241_v30 = vld [vmem:[%s1205_s1 + $0x78] sm:$0xff]  ;;  %v272_v31 = vld [vmem:[%s1205_s1 + $0x170] sm:$0xff]  ;;  %v785_v32 = vpack.c.bf16 %v289_v24, %v288_v23  ;;  %v306_v34 = vld [vmem:[%s1205_s1 + $0x280] sm:$0xff] }
  0x1b   : > { %776 = vmatpush3.bf16.msra.mxu1 %v775_v63  ;;  %v273_v33 = vld [vmem:[%s1205_s1 + $0x178] sm:$0xff]  ;;  %v307_v35 = vld [vmem:[%s1205_s1 + $0x288] sm:$0xff]  ;;  %v755_v36 = vpack.c.bf16 %v241_v30, %v240_v29  ;;  %v290_v39 = vld [vmem:[%s1205_s1 + $0x200] sm:$0xff] }
  0x1c   : > { %778 = vmatprep.subr.bf16.mxu1 %v777_v4  ;;  %472 = vmatprep.mubr.f32.mxu1 %v333_v25  ;;  %v787_v37 = vpack.c.bf16 %v273_v33, %v272_v31  ;;  %v789_v38 = vpack.c.bf16 %v307_v35, %v306_v34  ;;  %v291_v40 = vld [vmem:[%s1205_s1 + $0x208] sm:$0xff]  ;;  %v308_v41 = vld [vmem:[%s1205_s1 + $0x290] sm:$0xff]  ;;  %v309_v42 = vld [vmem:[%s1205_s1 + $0x298] sm:$0xff] }
  0x1d   : > { %748 = vmatpush3.bf16.msra.mxu0 %v747_v10  ;;  %v791_v43 = vpack.c.bf16 %v291_v40, %v290_v39  ;;  %v225_v44 = vld [vmem:[%s1036_s26 + $0x10] sm:$0xff]  ;;  %v793_v45 = vpack.c.bf16 %v309_v42, %v308_v41  ;;  %v293_v47 = vld [vmem:[%s1205_s1 + $0x218] sm:$0xff]  ;;  %v310_v49 = vld [vmem:[%s1205_s1 + $0x2a0] sm:$0xff] }
  0x1e   : > { %750 = vmatprep.subr.bf16.mxu0 %v749_v14  ;;  %v292_v46 = vld [vmem:[%s1205_s1 + $0x210] sm:$0xff]  ;;  %v334_v48 = vcombine.high %v225_v44, %v225_v44  ;;  %v311_v50 = vld [vmem:[%s1205_s1 + $0x2a8] sm:$0xff]  ;;  %v294_v53 = vld [vmem:[%s1205_s1 + $0x220] sm:$0xff] }
  0x1f   : > { %780 = vmatpush3.bf16.msra.mxu1 %v779_v13  ;;  %v795_v51 = vpack.c.bf16 %v293_v47, %v292_v46  ;;  %v797_v52 = vpack.c.bf16 %v311_v50, %v310_v49  ;;  %v295_v54 = vld [vmem:[%s1205_s1 + $0x228] sm:$0xff]  ;;  %v312_v55 = vld [vmem:[%s1205_s1 + $0x2b0] sm:$0xff]  ;;  %v313_v56 = vld [vmem:[%s1205_s1 + $0x2b8] sm:$0xff] }
  0x20   : > { %782 = vmatprep.subr.bf16.mxu1 %v781_v19  ;;  %v799_v57 = vpack.c.bf16 %v295_v54, %v294_v53  ;;  %v801_v58 = vpack.c.bf16 %v313_v56, %v312_v55  ;;  %v296_v59 = vld [vmem:[%s1205_s1 + $0x230] sm:$0xff]  ;;  %v297_v60 = vld [vmem:[%s1205_s1 + $0x238] sm:$0xff]  ;;  %v314_v61 = vld [vmem:[%s1205_s1 + $0x2c0] sm:$0xff] }
  0x21   : > { %752 = vmatpush3.bf16.msra.mxu0 %v751_v26  ;;  %v315_v62 = vld [vmem:[%s1205_s1 + $0x2c8] sm:$0xff]  ;;  %v803_v63 = vpack.c.bf16 %v297_v60, %v296_v59  ;;  %v298_v1 = vld [vmem:[%s1205_s1 + $0x240] sm:$0xff]  ;;  %v316_v3 = vld [vmem:[%s1205_s1 + $0x2d0] sm:$0xff] }
  0x22   : > { %754 = vmatprep.subr.bf16.mxu0 %v753_v28  ;;  %v805_v0 = vpack.c.bf16 %v315_v62, %v314_v61  ;;  %v299_v2 = vld [vmem:[%s1205_s1 + $0x248] sm:$0xff]  ;;  %v317_v4 = vld [vmem:[%s1205_s1 + $0x2d8] sm:$0xff]  ;;  %v300_v7 = vld [vmem:[%s1205_s1 + $0x250] sm:$0xff] }
  0x23   : > { %784 = vmatpush3.bf16.msra.mxu1 %v783_v27  ;;  %v807_v5 = vpack.c.bf16 %v299_v2, %v298_v1  ;;  %v809_v6 = vpack.c.bf16 %v317_v4, %v316_v3  ;;  %v301_v8 = vld [vmem:[%s1205_s1 + $0x258] sm:$0xff]  ;;  %v318_v9 = vld [vmem:[%s1205_s1 + $0x2e0] sm:$0xff]  ;;  %v319_v10 = vld [vmem:[%s1205_s1 + $0x2e8] sm:$0xff] }
  0x24   : > { %786 = vmatprep.subr.bf16.mxu1 %v785_v32  ;;  %v811_v11 = vpack.c.bf16 %v301_v8, %v300_v7  ;;  %v302_v13 = vld [vmem:[%s1205_s1 + $0x260] sm:$0xff]  ;;  %v303_v14 = vld [vmem:[%s1205_s1 + $0x268] sm:$0xff]  ;;  %v320_v15 = vld [vmem:[%s1205_s1 + $0x2f0] sm:$0xff] }
  0x25   : > { %756 = vmatpush3.bf16.msra.mxu0 %v755_v36  ;;  %v321_v16 = vld [vmem:[%s1205_s1 + $0x2f8] sm:$0xff]  ;;  %v815_v17 = vpack.c.bf16 %v303_v14, %v302_v13  ;;  %v304_v19 = vld [vmem:[%s1205_s1 + $0x270] sm:$0xff]  ;;  %v549_v23 = vld [vmem:[%s1207_s3] sm:$0x1] }
  0x26   : > { %790 = vmatprep.subr.bf16.mxu0 %v789_v38  ;;  %v817_v18 = vpack.c.bf16 %v321_v16, %v320_v15  ;;  %v305_v20 = vld [vmem:[%s1205_s1 + $0x278] sm:$0xff]  ;;  %v617_v26 = vld [vmem:[%s1206_s2] ss:$0 sm:$0xff] }
  0x27   : > { %788 = vmatpush3.bf16.msra.mxu1 %v787_v37  ;;  %v819_v21 = vpack.c.bf16 %v305_v20, %v304_v19 }
  0x28   : > { %403 = vmatmul.mubr.f32.vlgmr.msra.gmra.mrb[0].mxu0 %v223_v12  ;;  %v813_v12 = vpack.c.bf16 %v319_v10, %v318_v9 }
  0x29   : > { %792 = vmatpush3.bf16.msra.mxu0 %v791_v43  ;;  %542 = vmatprep.mubr.f32.mxu0 %v334_v48 }
  0x2a   : > { %473 = vmatmul.mubr.f32.vlgmr.msra.gmra.mrb[0].mxu1 %v224_v22  ;;  %794 = vmatprep.subr.bf16.mxu0 %v793_v45  ;;  %v548_v22 = vld [vmem:[%s1208_s4] sm:$0x1f] }
  0x2b   : > { %v550_v24 = vadd.f32 %v549_v23, %v548_v22  ;;  %v553_v37 = vrot.slane %v548_v22, 1 }
  0x2d   : > { %796 = vmatpush3.bf16.msra.mxu0 %v795_v51  ;;  %551 = vst [vmem:[%s222_s13] sm:$0x1] %v550_v24 }
  0x2e   : > { %798 = vmatprep.subr.bf16.mxu0 %v797_v52 }
  0x31   : > { %800 = vmatpush3.bf16.msra.mxu0 %v799_v57 }
  0x32   : > { %802 = vmatprep.subr.bf16.mxu0 %v801_v58 }
  0x35   : > { %804 = vmatpush3.bf16.msra.mxu0 %v803_v63 }
  0x36   : > { %806 = vmatprep.subr.bf16.mxu0 %v805_v0 }
  0x39   : > { %808 = vmatpush3.bf16.msra.mxu0 %v807_v5 }
  0x3a   : > { %810 = vmatprep.subr.bf16.mxu0 %v809_v6 }
  0x3d   : > { %812 = vmatpush3.bf16.msra.mxu0 %v811_v11 }
  0x3e   : > { %814 = vmatprep.subr.bf16.mxu0 %v813_v12 }
  0x41   : > { %816 = vmatpush3.bf16.msra.mxu0 %v815_v17 }
  0x42   : > { %818 = vmatprep.subr.bf16.mxu0 %v817_v18 }
  0x45   : > { %820 = vmatpush3.bf16.msra.mxu0 %v819_v21 }
  0x48   : > { %543 = vmatmul.mubr.f32.vlgmr.msra.gmra.mrb[2].mxu0 %v225_v44 }
  0xfb   : > { %v652_v25 = vpop.f32.mrb[0].mxu0 }
  0xfc   : > { %v653_v27 = vpop.f32.mrb[1].mxu0 }
  0xfd   : > { %v687_v28 = vpop.f32.mrb[0].mxu1  ;;  %v654_v29 = vadd.f32 %v653_v27, %v652_v25 }
  0xfe   : > { %v688_v30 = vpop.f32.mrb[1].mxu1 }
  0xff   : > { %v689_v31 = vadd.f32 %v688_v30, %v687_v28  ;;  %v405_v32 = vadd.f32 %v654_v29, %v617_v26 }
 0x101   : > { %v475_v33 = vadd.f32 %v689_v31, %v405_v32 }
 0x11b   : > { %v722_v34 = vpop.f32.mrb[2].mxu0 }
 0x11c   : > { %v723_v35 = vpop.f32.mrb[3].mxu0 }
 0x11d   : > { %v724_v36 = vadd.f32 %v723_v35, %v722_v34 }
 0x11f   : > { %v545_v38 = vadd.f32 %v724_v36, %v475_v33 }
 0x121   : > { %v555_v39 = vadd.f32 %v553_v37, %v545_v38 }
 0x123   : > { %556 = vst [vmem:[%s222_s13 + $0x1] sm:$0xf] %v555_v39 }
 0x124 PF: > { %s15_s18 = sadd.s32 1, %s839_s18  }
 0x125   : > { %p12_p4 = scmp.ge.s32.totalorder %s15_s18, 4  }
 0x127   :  { %14 = sbr.rel (!%p12_p4) target bundleno = 1 (0x1), region = 70 }

// kernel: vit_forward.7
= control target key start
LH: loop header
LB: loop body
LE: loop exit
PB: predicated region body
PF: predicated region fallthrough
CT: control target
= control target key end

     0   :  { %vm24_vm0 = vcmask 1041408   ;;  %s387_s0 = inlined_call_operand.vmem [shape: f32[2,128], index: 0, kind: input, shape index: {}]   ;;  %s388_s1 = inlined_call_operand.vmem [shape: f32[1,128], index: 1, kind: input, shape index: {}]   ;;  %s389_s2 = inlined_call_operand.vmem [shape: f32[1,128], index: 2, kind: input, shape index: {}]   ;;  %s390_s3 = inlined_call_operand.vmem [shape: f32[128,128], index: 3, kind: input, shape index: {}]   ;;  %s391_s4 = inlined_call_operand.vmem [shape: f32[1,128], index: 4, kind: input, shape index: {}]   ;;  %s392_s5 = inlined_call_operand.hbm [shape: f32[2,128], index: 5, kind: output, shape index: {}]  }
   0x1   :  { %v21_v0 = vld [vmem:[%s387_s0] sm:$0x3] }
   0x2   :  { %10 = vsyncpa [#allocation3], 0  ;;  %v25_v1 = vsel %vm24_vm0, %v21_v0, 0.0  ;;  %v62_v7 = vld [vmem:[%s390_s3] sm:$0xff]  ;;  %v63_v8 = vld [vmem:[%s390_s3 + $0x8] sm:$0xff]  ;;  %v281_v10 = vmov 0.0|0.0  }
   0x3   :  { %26 = vadd.xlane.f32.xlu0 %v25_v1  ;;  %v226_v9 = vpack.c.bf16 %v63_v8, %v62_v7  ;;  %225 = vmatprep.subr.bf16.mxu0 %v281_v10  ;;  %v64_v11 = vld [vmem:[%s390_s3 + $0x10] sm:$0xff]  ;;  %v65_v12 = vld [vmem:[%s390_s3 + $0x18] sm:$0xff]  ;;  %v66_v14 = vld [vmem:[%s390_s3 + $0x20] sm:$0xff]  ;;  %vm282_vm1 = vmmov 0   ;;  %v283_v19 = vmov 0.0   ;;  %s284_s29 = smov [#allocation2]  }
   0x4   :  { %v229_v13 = vpack.c.bf16 %v65_v12, %v64_v11  ;;  %v67_v15 = vld [vmem:[%s390_s3 + $0x28] sm:$0xff]  ;;  %v68_v17 = vld [vmem:[%s390_s3 + $0x30] sm:$0xff]  ;;  %v69_v18 = vld [vmem:[%s390_s3 + $0x38] sm:$0xff]  ;;  %222 = vmatprep.mubr.msk.f32.mxu0 %vm282_vm1, %v283_v19  ;;  %s162_s30 = sshll.u32 %s284_s29, 4  ;;  %s163_s30 = int_to_ptr.vmem [resolvable:$true] %s162_s30 }
   0x5   :  { %227 = vmatpush3.bf16.msra.mxu0 %v226_v9  ;;  %v232_v16 = vpack.c.bf16 %v67_v15, %v66_v14  ;;  %v235_v20 = vpack.c.bf16 %v69_v18, %v68_v17  ;;  %v70_v21 = vld [vmem:[%s390_s3 + $0x40] sm:$0xff]  ;;  %v71_v22 = vld [vmem:[%s390_s3 + $0x48] sm:$0xff]  ;;  %v72_v24 = vld [vmem:[%s390_s3 + $0x50] sm:$0xff]  ;;  %p262_p1 = scmp.lt.s32.totalorder %s163_s30, %s163_s30 }
   0x6   :  { %228 = vmatprep.subr.bf16.mxu0 %v281_v10  ;;  %v238_v23 = vpack.c.bf16 %v71_v22, %v70_v21  ;;  %v73_v25 = vld [vmem:[%s390_s3 + $0x58] sm:$0xff]  ;;  %v74_v27 = vld [vmem:[%s390_s3 + $0x60] sm:$0xff]  ;;  %v75_v28 = vld [vmem:[%s390_s3 + $0x68] sm:$0xff] }
   0x7   :  { %v241_v26 = vpack.c.bf16 %v73_v25, %v72_v24  ;;  %v244_v29 = vpack.c.bf16 %v75_v28, %v74_v27  ;;  %v76_v30 = vld [vmem:[%s390_s3 + $0x70] sm:$0xff]  ;;  %v77_v31 = vld [vmem:[%s390_s3 + $0x78] sm:$0xff]  ;;  %v170_v37 = vld [vmem:[%s388_s1] ss:$0 sm:$0xff] }
   0x8   :  { %v247_v32 = vpack.c.bf16 %v77_v31, %v76_v30  ;;  %v171_v39 = vld [vmem:[%s389_s2] ss:$0 sm:$0xff]  ;;  %s257_s2 = scalar_lea.vmem %s163_s30, 32 }
   0x9   :  { %230 = vmatpush3.bf16.msra.mxu0 %v229_v13  ;;  %v172_v51 = vld [vmem:[%s391_s4] ss:$0 sm:$0xff]  ;;  %p258_p0 = scmp.ne.s32.totalorder %s163_s30, %s257_s2  ;;  %p263_p2 = scmp.lt.s32.totalorder %s257_s2, %s257_s2 }
   0xa   :  { %231 = vmatprep.subr.bf16.mxu0 %v281_v10 }
   0xb   :  { %p264_p3 = por %p263_p2, %p262_p1 }
   0xd   :  { %233 = vmatpush3.bf16.msra.mxu0 %v232_v16  ;;  %p265_p4 = pnand %p264_p3, %p258_p0 }
   0xe   :  { %234 = vmatprep.subr.bf16.mxu0 %v281_v10 }
  0x11   :  { %236 = vmatpush3.bf16.msra.mxu0 %v235_v20 }
  0x12   :  { %237 = vmatprep.subr.bf16.mxu0 %v281_v10 }
  0x15   :  { %239 = vmatpush3.bf16.msra.mxu0 %v238_v23 }
  0x16   :  { %240 = vmatprep.subr.bf16.mxu0 %v281_v10 }
  0x19   :  { %242 = vmatpush3.bf16.msra.mxu0 %v241_v26 }
  0x1a   :  { %243 = vmatprep.subr.bf16.mxu0 %v281_v10 }
  0x1d   :  { %245 = vmatpush3.bf16.msra.mxu0 %v244_v29 }
  0x1e   :  { %246 = vmatprep.subr.bf16.mxu0 %v281_v10 }
  0x21   :  { %248 = vmatpush3.bf16.msra.mxu0 %v247_v32 }
  0x90   :  { %v27_v2 = vpop.xlane.xlu0 %26 }
  0x91   :  { %v29_v3 = vmul.f32 0.0078125, %v27_v2 }
  0x93   :  { %v30_v4 = vsub.f32 %v21_v0, %v29_v3 }
  0x95   :  { %v31_v5 = vmul.f32 %v30_v4, %v30_v4 }
  0x97   :  { %v32_v6 = vsel %vm24_vm0, %v31_v5, 0.0 }
  0x98   :  { %33 = vadd.xlane.f32.xlu0 %v32_v6 }
 0x125   :  { %v34_v33 = vpop.xlane.xlu0 %33 }
 0x126   :  { %v35_v34 = vmul.f32 0.0078125, %v34_v33 }
 0x128   :  { %v36_v35 = vadd.f32 1e-06, %v35_v34 }
 0x12a   :  { %253 = vrsqrt.f32 %v36_v35 }
 0x134   :  { %v254_v36 = vpop.eup %253 }
 0x135   :  { %v38_v38 = vmul.f32 %v254_v36, %v30_v4 }
 0x137   :  { %v45_v40 = vmul.f32 %v170_v37, %v38_v38 }
 0x139   :  { %v52_v41 = vadd.f32 %v171_v39, %v45_v40 }
 0x13b   :  { %v54_v42 = vmul.f32 0.044715, %v52_v41  ;;  %v53_v48 = vmul.f32 0.5, %v52_v41 }
 0x13d   :  { %v55_v43 = vmul.f32 %v54_v42, %v52_v41 }
 0x13f   :  { %v56_v44 = vmul.f32 %v55_v43, %v52_v41 }
 0x141   :  { %v57_v45 = vadd.f32 %v56_v44, %v52_v41 }
 0x143   :  { %v58_v46 = vmul.f32 0.7978846, %v57_v45 }
 0x145   :  { %255 = vtanh.f32 %v58_v46 }
 0x14f   :  { %v256_v47 = vpop.eup %255 }
 0x150   :  { %v60_v49 = vadd.f32 1.0, %v256_v47 }
 0x152   :  { %v61_v50 = vmul.f32 %v60_v49, %v53_v48 }
 0x154   :  { %223 = vmatmul.mubr.f32.vlgmr.msra.gmra.mrb[0].mxu0 %v61_v50 }
 0x227   :  { %v151_v52 = vpop.f32.mrb[0].mxu0 }
 0x228   :  { %v152_v53 = vadd.f32 %v172_v51, %v151_v52  ;;  %v224_v54 = vpop.f32.mrb[1].mxu0 }
 0x22a   :  { %155 = vst [vmem:[#allocation2] sm:$0x3] %v152_v53 }
 0x22b   :  { %268 = shalt.err (!%p265_p4)
}
 0x22c   :  { %s269_s8 = scalar_lea.hbm %s392_s5, 32 }
 0x22d   :  { %p270_p5 = scmp.ne.s32.totalorder %s392_s5, %s269_s8  ;;  %p273_p6 = scmp.lt.u32.totalorder %s269_s8, %s392_s5 }
 0x22f   :  { %p275_p7 = pnand %p273_p6, %p270_p5 }
 0x231   :  { %278 = shalt.err (!%p275_p7)
}
 0x232   :  { %165 = dma.vmem_to_hbm [thread:$0]  %s163_s30, 32, %s392_s5, [#allocation3]  }
 0x233   :  { %279 = dma.done.wait [#allocation3], 32  }
 0x234   :  { %280 = vsyncadd [#allocation3], 4294967264 }
 0x235   :  { %169 = vsyncpa [#allocation3], 1 }

// kernel: vit_forward.5
= control target key start
LH: loop header
LB: loop body
LE: loop exit
PB: predicated region body
PF: predicated region fallthrough
CT: control target
= control target key end

     0   :  { %s2828_s25 = smov 0   ;;  %s3605_s0 = inlined_call_operand.vmem [shape: f32[2,5,128], index: 0, kind: input, shape index: {}]   ;;  %s3606_s1 = inlined_call_operand.vmem [shape: f32[1,128], index: 1, kind: input, shape index: {}]   ;;  %s3607_s2 = inlined_call_operand.vmem [shape: f32[1,128], index: 2, kind: input, shape index: {}]   ;;  %s3608_s3 = inlined_call_operand.vmem [shape: f32[128,384], index: 3, kind: input, shape index: {}]   ;;  %s3609_s4 = inlined_call_operand.vmem [shape: f32[1,384], index: 4, kind: input, shape index: {}]   ;;  %s3610_s5 = inlined_call_operand.vmem [shape: f32[128,128], index: 5, kind: input, shape index: {}]   ;;  %s3611_s6 = inlined_call_operand.vmem [shape: f32[1,128], index: 6, kind: input, shape index: {}]   ;;  %s3612_s7 = inlined_call_operand.vmem [shape: f32[1,128], index: 7, kind: input, shape index: {}]   ;;  %s3613_s8 = inlined_call_operand.vmem [shape: f32[1,128], index: 8, kind: input, shape index: {}]   ;;  %s3614_s9 = inlined_call_operand.vmem [shape: f32[128,512], index: 9, kind: input, shape index: {}]   ;;  %s3615_s10 = inlined_call_operand.vmem [shape: f32[1,512], index: 10, kind: input, shape index: {}]   ;;  %s3616_s11 = inlined_call_operand.vmem [shape: f32[512,128], index: 11, kind: input, shape index: {}]   ;;  %s3617_s12 = inlined_call_operand.vmem [shape: f32[1,128], index: 12, kind: input, shape index: {}]   ;;  %s3618_s13 = inlined_call_operand.vmem [shape: f32[2,5,128], index: 13, kind: output, shape index: {}]  }
   0x1 LB: > { %s2217_s26 = sadd.s32 4294967295, %s2750_s25   ;;  %p2221_p0 = scmp.ge.s32.totalorder %s2750_s25, 1  ;;  %s2750_s25 = sphi %s2828_s25, %s23_s25  }
   0x2   : > { %p386_p1 = scmp.lt.s32.totalorder %s2750_s25, 3 }
   0x4   : > { %p387_p2 = pnand %p2221_p0, %p386_p1 }
   0x5   : > { %p428_p3 = scmp.lt.s32.totalorder (!%p387_p2), %s2217_s26, 1  ;;  %vm439_vm0 = vcmask (!%p387_p2), 1044480   ;;  %v469_v2 = vld [vmem:[%s3608_s3 + $0x8] sm:$0xff] (!%p387_p2)  ;;  %v472_v3 = vld [vmem:[%s3608_s3 + $0x20] sm:$0xff] (!%p387_p2)  ;;  %v2752_v6 = vmov (!%p387_p2), 0.0|0.0   ;;  %v471_v7 = vld [vmem:[%s3608_s3 + $0x18] sm:$0xff] (!%p387_p2) }
   0x6   : > { %390 = sbr.rel (%p387_p2) target bundleno = 3668 (0xe54), region = 72  ;;  %v468_v4 = vld [vmem:[%s3608_s3] sm:$0xff] (!%p387_p2)  ;;  %v2494_v5 = vpack.c.bf16 (!%p387_p2), %v472_v3, %v469_v2  ;;  %2526 = vmatprep.subr.bf16.mxu1 (!%p387_p2), %v2752_v6  ;;  %v470_v8 = vld [vmem:[%s3608_s3 + $0x10] sm:$0xff] (!%p387_p2)  ;;  %v473_v9 = vld [vmem:[%s3608_s3 + $0x28] sm:$0xff] (!%p387_p2)  ;;  %v2753_v59 = vmov (!%p387_p2), 0.0   ;;  %vm2754_vm1 = vmmov (!%p387_p2), 0  }
   0x7   : > { %v2496_v10 = vpack.c.bf16 (!%p387_p2), %v471_v7, %v468_v4  ;;  %v2527_v11 = vpack.c.bf16 (!%p387_p2), %v473_v9, %v470_v8  ;;  %v475_v12 = vld [vmem:[%s3608_s3 + $0x38] sm:$0xff] (!%p387_p2)  ;;  %v478_v13 = vld [vmem:[%s3608_s3 + $0x50] sm:$0xff] (!%p387_p2)  ;;  %v477_v16 = vld [vmem:[%s3608_s3 + $0x48] sm:$0xff] (!%p387_p2)  ;;  %597 = vmatprep.mubr.f32.mxu0 (!%p387_p2), %v2753_v59  ;;  %2407 = vmatprep.mubr.msk.f32.mxu1 (!%p387_p2), %vm2754_vm1, %v2753_v59  ;;  %vm691_vm2 = vcmask (!%p387_p2), 261120   ;;  %s2755_s18 = smov (!%p387_p2), 96   ;;  %vm768_vm3 = vcmask (!%p387_p2), 36864  }
   0x8   : > { %v474_v14 = vld [vmem:[%s3608_s3 + $0x30] sm:$0xff] (!%p387_p2)  ;;  %2495 = vmatprep.subr.bf16.mxu0 (!%p387_p2), %v2494_v5  ;;  %v2498_v15 = vpack.c.bf16 (!%p387_p2), %v478_v13, %v475_v12  ;;  %v476_v17 = vld [vmem:[%s3608_s3 + $0x40] sm:$0xff] (!%p387_p2)  ;;  %v479_v18 = vld [vmem:[%s3608_s3 + $0x58] sm:$0xff] (!%p387_p2)  ;;  %s2756_s19 = smov (!%p387_p2), 64   ;;  %vm780_vm4 = vcmask (!%p387_p2), 39936   ;;  %s2757_s23 = smov (!%p387_p2), 32  }
   0x9   : > { %2497 = vmatpush1.bf16.msra.mxu0 (!%p387_p2), %v2496_v10  ;;  %2528 = vmatpush3.bf16.msra.mxu1 (!%p387_p2), %v2527_v11  ;;  %v2500_v19 = vpack.c.bf16 (!%p387_p2), %v477_v16, %v474_v14  ;;  %v2530_v20 = vpack.c.bf16 (!%p387_p2), %v479_v18, %v476_v17  ;;  %v481_v21 = vld [vmem:[%s3608_s3 + $0x68] sm:$0xff] (!%p387_p2)  ;;  %v484_v22 = vld [vmem:[%s3608_s3 + $0x80] sm:$0xff] (!%p387_p2)  ;;  %v483_v25 = vld [vmem:[%s3608_s3 + $0x78] sm:$0xff] (!%p387_p2) }
   0xa   : > { %v480_v23 = vld [vmem:[%s3608_s3 + $0x60] sm:$0xff] (!%p387_p2)  ;;  %2499 = vmatprep.subr.bf16.mxu0 (!%p387_p2), %v2498_v15  ;;  %2529 = vmatprep.subr.bf16.mxu1 (!%p387_p2), %v2752_v6  ;;  %v2502_v24 = vpack.c.bf16 (!%p387_p2), %v484_v22, %v481_v21  ;;  %v482_v26 = vld [vmem:[%s3608_s3 + $0x70] sm:$0xff] (!%p387_p2)  ;;  %v485_v27 = vld [vmem:[%s3608_s3 + $0x88] sm:$0xff] (!%p387_p2) }
   0xb   : > { %v2504_v28 = vpack.c.bf16 (!%p387_p2), %v483_v25, %v480_v23  ;;  %v2533_v29 = vpack.c.bf16 (!%p387_p2), %v485_v27, %v482_v26  ;;  %v487_v35 = vld [vmem:[%s3608_s3 + $0x98] sm:$0xff] (!%p387_p2)  ;;  %v490_v36 = vld [vmem:[%s3608_s3 + $0xb0] sm:$0xff] (!%p387_p2)  ;;  %v489_v39 = vld [vmem:[%s3608_s3 + $0xa8] sm:$0xff] (!%p387_p2) }
   0xc   : > { %v2506_v37 = vpack.c.bf16 (!%p387_p2), %v490_v36, %v487_v35  ;;  %v486_v38 = vld [vmem:[%s3608_s3 + $0x90] sm:$0xff] (!%p387_p2)  ;;  %v488_v40 = vld [vmem:[%s3608_s3 + $0xa0] sm:$0xff] (!%p387_p2)  ;;  %v491_v42 = vld [vmem:[%s3608_s3 + $0xb8] sm:$0xff] (!%p387_p2) }
   0xd   : > { %s3620_s26 = smov (!%p428_p3, %s2217_s26), 1  ;;  %2501 = vmatpush1.bf16.msra.mxu0 %v2500_v19  ;;  %2531 = vmatpush3.bf16.msra.mxu1 %v2530_v20  ;;  %v2508_v41 = vpack.c.bf16 %v489_v39, %v486_v38  ;;  %v2536_v43 = vpack.c.bf16 %v491_v42, %v488_v40  ;;  %v493_v44 = vld [vmem:[%s3608_s3 + $0xc8] sm:$0xff]  ;;  %v496_v45 = vld [vmem:[%s3608_s3 + $0xe0] sm:$0xff]  ;;  %v495_v48 = vld [vmem:[%s3608_s3 + $0xd8] sm:$0xff] }
   0xe   : > { %s2222_s27 = sshll.u32 %s3620_s26, 3  ;;  %2503 = vmatprep.subr.bf16.mxu0 %v2502_v24  ;;  %2532 = vmatprep.subr.bf16.mxu1 %v2752_v6  ;;  %v2510_v46 = vpack.c.bf16 %v496_v45, %v493_v44  ;;  %v492_v47 = vld [vmem:[%s3608_s3 + $0xc0] sm:$0xff]  ;;  %v494_v49 = vld [vmem:[%s3608_s3 + $0xd0] sm:$0xff]  ;;  %v497_v51 = vld [vmem:[%s3608_s3 + $0xe8] sm:$0xff] }
   0xf   : > { %s431_s30 = scalar_lea.vmem %s3605_s0, %s2222_s27  ;;  %v2512_v50 = vpack.c.bf16 %v495_v48, %v492_v47  ;;  %v499_v52 = vld [vmem:[%s3608_s3 + $0xf8] sm:$0xff]  ;;  %v502_v53 = vld [vmem:[%s3608_s3 + $0x110] sm:$0xff]  ;;  %v2539_v54 = vpack.c.bf16 %v497_v51, %v494_v49  ;;  %v501_v57 = vld [vmem:[%s3608_s3 + $0x108] sm:$0xff] }
  0x10   : > { %v2844_v0 = vld [vmem:[%s431_s30] sm:$0x1f]  ;;  %v2514_v55 = vpack.c.bf16 %v502_v53, %v499_v52  ;;  %v498_v56 = vld [vmem:[%s3608_s3 + $0xf0] sm:$0xff]  ;;  %v503_v61 = vld [vmem:[%s3608_s3 + $0x118] sm:$0xff]  ;;  %s435_s30 = scalar_lea.vmem %s3618_s13, %s2222_s27 }
  0x11   : > { %v440_v1 = vsel %vm439_vm0, %v2844_v0, 0.0  ;;  %2505 = vmatpush1.bf16.msra.mxu0 %v2504_v28  ;;  %2534 = vmatpush3.bf16.msra.mxu1 %v2533_v29  ;;  %v500_v58 = vld [vmem:[%s3608_s3 + $0x100] sm:$0xff]  ;;  %v2516_v60 = vpack.c.bf16 %v501_v57, %v498_v56  ;;  %v505_v62 = vld [vmem:[%s3608_s3 + $0x128] sm:$0xff]  ;;  %v507_v4 = vld [vmem:[%s3608_s3 + $0x138] sm:$0xff]  ;;  %v518_v28 = vlaneseq }
  0x12   : > { %441 = vadd.xlane.f32.xlu0 %v440_v1  ;;  %2535 = vmatprep.subr.bf16.mxu1 %v2752_v6  ;;  %v508_v63 = vld [vmem:[%s3608_s3 + $0x140] sm:$0xff]  ;;  %v2542_v1 = vpack.c.bf16 %v503_v61, %v500_v58  ;;  %v506_v5 = vld [vmem:[%s3608_s3 + $0x130] sm:$0xff]  ;;  %v509_v7 = vld [vmem:[%s3608_s3 + $0x148] sm:$0xff] }
  0x13   : > { %2507 = vmatprep.subr.bf16.mxu0 %v2506_v37  ;;  %v2518_v2 = vpack.c.bf16 %v508_v63, %v505_v62  ;;  %v504_v3 = vld [vmem:[%s3608_s3 + $0x120] sm:$0xff]  ;;  %v511_v8 = vld [vmem:[%s3608_s3 + $0x158] sm:$0xff]  ;;  %v514_v9 = vld [vmem:[%s3608_s3 + $0x170] sm:$0xff]  ;;  %v2545_v11 = vpack.c.bf16 %v509_v7, %v506_v5  ;;  %v3022_v29 = vshrl.u32 %v518_v28, 7 }
  0x14   : > { %v2520_v10 = vpack.c.bf16 %v507_v4, %v504_v3  ;;  %v2522_v12 = vpack.c.bf16 %v514_v9, %v511_v8  ;;  %v510_v13 = vld [vmem:[%s3608_s3 + $0x150] sm:$0xff]  ;;  %v513_v14 = vld [vmem:[%s3608_s3 + $0x168] sm:$0xff]  ;;  %v512_v15 = vld [vmem:[%s3608_s3 + $0x160] sm:$0xff] }
  0x15   : > { %2509 = vmatpush1.bf16.msra.mxu0 %v2508_v41  ;;  %2537 = vmatpush3.bf16.msra.mxu1 %v2536_v43  ;;  %v515_v16 = vld [vmem:[%s3608_s3 + $0x178] sm:$0xff]  ;;  %v2524_v17 = vpack.c.bf16 %v513_v14, %v510_v13  ;;  %v2224_v23 = vld [vmem:[%s3606_s1] ss:$0 sm:$0xff]  ;;  %v679_v5 = vld [vmem:[%s3610_s5 + $0x28] sm:$0xff] }
  0x16   : > { %2538 = vmatprep.subr.bf16.mxu1 %v2752_v6  ;;  %2511 = vmatprep.subr.bf16.mxu0 %v2510_v46  ;;  %v2548_v18 = vpack.c.bf16 %v515_v16, %v512_v15  ;;  %v2225_v25 = vld [vmem:[%s3607_s2] ss:$0 sm:$0xff]  ;;  %v680_v7 = vld [vmem:[%s3610_s5 + $0x30] sm:$0xff]  ;;  %v681_v9 = vld [vmem:[%s3610_s5 + $0x38] sm:$0xff] }
  0x17   : > { %v678_v4 = vld [vmem:[%s3610_s5 + $0x20] sm:$0xff]  ;;  %v675_v14 = vld [vmem:[%s3610_s5 + $0x8] sm:$0xff] }
  0x18   : > { %v2551_v8 = vpack.c.bf16 %v679_v5, %v678_v4  ;;  %v674_v13 = vld [vmem:[%s3610_s5] sm:$0xff] }
  0x19   : > { %2513 = vmatpush1.bf16.msra.mxu0 %v2512_v50  ;;  %2540 = vmatpush3.bf16.msra.mxu1 %v2539_v54  ;;  %v2557_v16 = vpack.c.bf16 %v675_v14, %v674_v13 }
  0x1a   : > { %2515 = vmatprep.subr.bf16.mxu0 %v2514_v55  ;;  %2541 = vmatprep.subr.bf16.mxu1 %v2752_v6 }
  0x1d   : > { %2517 = vmatpush1.bf16.msra.mxu0 %v2516_v60  ;;  %2543 = vmatpush3.bf16.msra.mxu1 %v2542_v1 }
  0x1e   : > { %2519 = vmatprep.subr.bf16.mxu0 %v2518_v2  ;;  %2544 = vmatprep.subr.bf16.mxu1 %v2752_v6 }
  0x21   : > { %2521 = vmatpush1.bf16.msra.mxu0 %v2520_v10  ;;  %2546 = vmatpush3.bf16.msra.mxu1 %v2545_v11  ;;  %v2554_v10 = vpack.c.bf16 %v681_v9, %v680_v7  ;;  %v686_v7 = vld [vmem:[%s3610_s5 + $0x60] sm:$0xff] }
  0x22   : > { %2523 = vmatprep.subr.bf16.mxu0 %v2522_v12  ;;  %2547 = vmatprep.subr.bf16.mxu1 %v2752_v6 }
  0x25   : > { %2525 = vmatpush1.bf16.msra.mxu0 %v2524_v17  ;;  %2549 = vmatpush3.bf16.msra.mxu1 %v2548_v18  ;;  %v676_v18 = vld [vmem:[%s3610_s5 + $0x10] sm:$0xff] }
  0x26   : > { %2420 = vmatprep.subr.mxu0 %v2753_v59  ;;  %2410 = vmatprep.subr.mxu1 %v2753_v59 }
  0x9f   : > { %v442_v30 = vpop.xlane.xlu0 %441 }
  0xa0   : > { %v444_v31 = vmul.f32 0.0078125, %v442_v30  ;;  %v520_v30 = vsub.s32 0, %v3022_v29 }
  0xa2   : > { %v2907_v32 = vsub.f32 %v2844_v0, %v444_v31  ;;  %v516_v31 = vld [vmem:[%s3609_s4] sm:$0x7] }
  0xa4   : > { %v446_v33 = vmul.f32 %v2907_v32, %v2907_v32 }
  0xa6   : > { %v447_v34 = vsel %vm439_vm0, %v446_v33, 0.0  ;;  %v521_v33 = vrot.slane %v516_v31, %v520_v30 }
  0xa7   : > { %448 = vadd.xlane.f32.xlu0 %v447_v34  ;;  %v528_v34 = vsub.s32 2, %v3022_v29 }
  0xa9   : > { %v529_v41 = vrot.slane %v516_v31, %v528_v34 }
 0x134   : > { %v449_v19 = vpop.xlane.xlu0 %448 }
 0x135   : > { %v450_v20 = vmul.f32 0.0078125, %v449_v19  ;;  %v677_v19 = vld [vmem:[%s3610_s5 + $0x18] sm:$0xff] }
 0x137   : > { %v451_v21 = vadd.f32 1e-06, %v450_v20  ;;  %v2560_v20 = vpack.c.bf16 %v677_v19, %v676_v18 }
 0x139   : > { %2716 = vrsqrt.f32 %v451_v21 }
 0x143   : > { %v2717_v22 = vpop.eup %2716 }
 0x144   : > { %v453_v24 = vmul.f32 %v2717_v22, %v2907_v32  ;;  %v524_v32 = vsub.s32 1, %v3022_v29 }
 0x146   : > { %v460_v26 = vmul.f32 %v2224_v23, %v453_v24  ;;  %v525_v35 = vrot.slane %v516_v31, %v524_v32 }
 0x148   : > { %v467_v27 = vadd.f32 %v2225_v25, %v460_v26 }
 0x14a   : > { %598 = vmatmul.mubr.f32.vlgmr.msra.gmra.mrb[0].mxu0 %v467_v27  ;;  %2408 = vmatmul.mubr.f32.vlgmr.msra.gmra.mrb[0].mxu1 %v467_v27 }
 0x14b   : > { %2412 = vmatprep.mubr.msk.f32.mxu1 %vm2754_vm1, %v2753_v59  ;;  %2422 = vmatprep.mubr.msk.f32.mxu0 %vm2754_vm1, %v2753_v59 }
 0x21d   : > { %v599_v36 = vpop.f32.mrb[0].mxu0  ;;  %v670_v37 = vpop.f32.mrb[0].mxu1 }
 0x21e   : > { %v600_v38 = vadd.f32 %v599_v36, %v521_v33  ;;  %v601_v39 = vpop.f32.mrb[1].mxu0  ;;  %v2409_v40 = vpop.f32.mrb[1].mxu1  ;;  %v3045_v44 = vadd.f32 %v670_v37, %v529_v41 }
 0x21f   : > { %v3036_v42 = vadd.f32 %v601_v39, %v525_v35 }
 0x220   : > { %v3042_v43 = vmul.f32 0.17677669, %v600_v38 }
 0x221   : > { %859 = vrot.lane.b32.xlu1 %v3036_v42, %s2755_s18  ;;  %2411 = vmatpush3.xpose.msk.msra.mxu1 %vm691_vm2, %v3036_v42 }
 0x222   : > { %2415 = vmatprep.subr.mxu1 %v2753_v59 }
 0x224   : > { %2413 = vmatmul.mubr.msk.f32.vlgmr.msra.gmra.mrb[2].mxu1 %vm691_vm2, %v3042_v43 }
 0x225   : > { %857 = vrot.lane.b32.xlu1 %v3042_v43, %s2755_s18  ;;  %2416 = vmatpush3.msk.msra.mxu1 %vm439_vm0, %v3045_v44 }
 0x226   : > { %2417 = vmatprep.mubr.msk.f32.mxu1 %vm2754_vm1, %v2753_v59  ;;  %2425 = vmatprep.subr.mxu1 %v2753_v59 }
 0x293   : > { %v860_v45 = vpop.permute.xlu1 %859 }
 0x294   : > { %2421 = vmatpush3.xpose.msk.msra.mxu0 %vm691_vm2, %v860_v45 }
 0x295   : > { %2550 = vmatprep.subr.bf16.mxu0 %v2752_v6 }
 0x297   : > { %v858_v46 = vpop.permute.xlu1 %857 }
 0x298   : > { %2423 = vmatmul.mubr.msk.f32.vlgmr.msra.gmra.mrb[2].mxu0 %vm691_vm2, %v858_v46 }
 0x299   : > { %2438 = vmatprep.mubr.msk.f32.mxu0 %vm2754_vm1, %v2753_v59  ;;  %2552 = vmatpush3.bf16.msra.mxu0 %v2551_v8  ;;  %v687_v8 = vld [vmem:[%s3610_s5 + $0x68] sm:$0xff] }
 0x29a   : > { %2553 = vmatprep.subr.bf16.mxu0 %v2752_v6  ;;  %v2569_v9 = vpack.c.bf16 %v687_v8, %v686_v7 }
 0x29d   : > { %2555 = vmatpush3.bf16.msra.mxu0 %v2554_v10  ;;  %v689_v10 = vld [vmem:[%s3610_s5 + $0x78] sm:$0xff] }
 0x29e   : > { %2452 = vmatprep.subr.mxu0 %v2753_v59 }
 0x2f7   : > { %v764_v47 = vpop.f32.mrb[2].mxu1 }
 0x2f8   : > { %v2414_v48 = vpop.f32.mrb[3].mxu1  ;;  %v769_v49 = vsel %vm768_vm3, %v764_v47, -inf }
 0x2f9   : > { %770 = vmax.xlane.f32.xlu0 %v769_v49  ;;  %v683_v48 = vld [vmem:[%s3610_s5 + $0x48] sm:$0xff]  ;;  %v684_v49 = vld [vmem:[%s3610_s5 + $0x50] sm:$0xff] }
 0x36b   : > { %v931_v50 = vpop.f32.mrb[2].mxu0 }
 0x36c   : > { %v2424_v51 = vpop.f32.mrb[3].mxu0  ;;  %v935_v52 = vsel %vm768_vm3, %v931_v50, -inf }
 0x36d   : > { %936 = vmax.xlane.f32.xlu1 %v935_v52  ;;  %v685_v51 = vld [vmem:[%s3610_s5 + $0x58] sm:$0xff] }
 0x36e   : > { %v2566_v52 = vpack.c.bf16 %v685_v51, %v684_v49  ;;  %v1699_v49 = vld [vmem:[%s3614_s9 + $0x60] sm:$0xff] }
 0x37e   : > { %1169 = vrot.lane.b32.xlu1 %v3042_v43, %s2756_s19 }
 0x386   : > { %v771_v53 = vpop.xlane.xlu0 %770 }
 0x387   : > { %v772_v54 = vsub.f32 %v764_v47, %v771_v53 }
 0x389   : > { %v773_v55 = vmul.f32 1.442695, %v772_v54 }
 0x38b   : > { %2718 = vpow2.f32 %v773_v55 }
 0x395   : > { %v2719_v56 = vpop.eup %2718 }
 0x396   : > { %v775_v57 = vsel %vm768_vm3, %v2719_v56, 0.0 }
 0x397   : > { %776 = vadd.xlane.f32.xlu0 %v775_v57 }
 0x3fa   : > { %v937_v58 = vpop.xlane.xlu1 %936 }
 0x3fb   : > { %v938_v60 = vsub.f32 %v931_v50, %v937_v58 }
 0x3fd   : > { %v939_v61 = vmul.f32 1.442695, %v938_v60 }
 0x3fe   : > { %v1170_v26 = vpop.permute.xlu1 %1169 }
 0x3ff   : > { %2720 = vpow2.f32 %v939_v61 }
 0x409   : > { %v2721_v62 = vpop.eup %2720 }
 0x40a   : > { %v941_v63 = vsel %vm768_vm3, %v2721_v62, 0.0 }
 0x40b   : > { %942 = vadd.xlane.f32.xlu0 %v941_v63 }
 0x421   : > { %946 = vrot.lane.b32.xlu0 %v3045_v44, %s2755_s18 }
 0x424   : > { %v777_v1 = vpop.xlane.xlu0 %776 }
 0x425   : > { %2722 = vrcp.f32 %v777_v1  ;;  %1171 = vrot.lane.b32.xlu0 %v3036_v42, %s2756_s19 }
 0x42f   : > { %v2723_v2 = vpop.eup %2722 }
 0x430   : > { %v779_v3 = vmul.f32 %v2723_v2, %v2719_v56 }
 0x432   : > { %2418 = vmatmul.mubr.msk.f32.vlgmr.msra.gmra.mrb[4].mxu1 %vm780_vm4, %v779_v3 }
 0x433   : > { %2427 = vmatprep.mubr.msk.f32.mxu1 %vm2754_vm1, %v2753_v59 }
 0x498   : > { %v943_v11 = vpop.xlane.xlu0 %942 }
 0x499   : > { %2724 = vrcp.f32 %v943_v11 }
 0x49c   : > { %v947_v12 = vpop.permute.xlu0 %946 }
 0x49d   : > { %2426 = vmatpush3.msk.msra.mxu1 %vm439_vm0, %v947_v12 }
 0x49e   : > { %2556 = vmatprep.subr.bf16.mxu1 %v2752_v6 }
 0x4a0   : > { %v1172_v24 = vpop.permute.xlu0 %1171 }
 0x4a3   : > { %v2725_v15 = vpop.eup %2724 }
 0x4a4   : > { %v945_v17 = vmul.f32 %v2725_v15, %v2721_v62 }
 0x4a6   : > { %2428 = vmatmul.mubr.msk.f32.vlgmr.msra.gmra.mrb[6].mxu1 %vm780_vm4, %v945_v17 }
 0x4a7   : > { %2558 = vmatpush3.bf16.msra.mxu1 %v2557_v16  ;;  %2449 = vmatprep.mubr.msk.f32.mxu1 %vm2754_vm1, %v2753_v59 }
 0x4a8   : > { %2559 = vmatprep.subr.bf16.mxu1 %v2752_v6 }
 0x4ab   : > { %2561 = vmatpush3.bf16.msra.mxu1 %v2560_v20 }
 0x4ac   : > { %2457 = vmatprep.subr.mxu1 %v2753_v59 }
 0x505   : > { %v853_v21 = vpop.f32.mrb[4].mxu1 }
 0x506   : > { %v2419_v22 = vpop.f32.mrb[5].mxu1  ;;  %2450 = vmatmul.mubr.msk.f32.vlgmr.msra.gmra.mrb[8].mxu1 %vm691_vm2, %v853_v21 }
 0x507   : > { %2459 = vmatprep.mubr.msk.f32.mxu1 %vm2754_vm1, %v2753_v59  ;;  %v2246_v22 = vld [vmem:[%s3611_s6] ss:$0 sm:$0xff] }
 0x579   : > { %v1019_v23 = vpop.f32.mrb[6].mxu1 }
 0x57a   : > { %v2429_v25 = vpop.f32.mrb[7].mxu1  ;;  %2439 = vmatmul.mubr.msk.f32.vlgmr.msra.gmra.mrb[4].mxu0 %vm691_vm2, %v1019_v23 }
 0x57b   : > { %2453 = vmatpush3.xpose.msk.msra.mxu0 %vm691_vm2, %v1172_v24  ;;  %2454 = vmatprep.mubr.msk.f32.mxu0 %vm2754_vm1, %v2753_v59 }
 0x57c   : > { %2562 = vmatprep.subr.bf16.mxu0 %v2752_v6 }
 0x57e   : > { %2455 = vmatmul.mubr.msk.f32.vlgmr.msra.gmra.mrb[6].mxu0 %vm691_vm2, %v1170_v26  ;;  %v1688_v26 = vld [vmem:[%s3614_s9 + $0x8] sm:$0xff] }
 0x57f   : > { %2470 = vmatprep.mubr.msk.f32.mxu0 %vm2754_vm1, %v2753_v59 }
 0x5d9   : > { %v1165_v27 = vpop.f32.mrb[8].mxu1 }
 0x5da   : > { %v2451_v28 = vpop.f32.mrb[9].mxu1 }
 0x64d   : > { %v1092_v31 = vpop.f32.mrb[4].mxu0 }
 0x64e   : > { %v3118_v33 = vadd.f32 %v1165_v27, %v1092_v31  ;;  %v2440_v35 = vpop.f32.mrb[5].mxu0  ;;  %v1690_v27 = vld [vmem:[%s3614_s9 + $0x18] sm:$0xff]  ;;  %v1687_v31 = vld [vmem:[%s3614_s9] sm:$0xff] }
 0x651   : > { %v1243_v36 = vpop.f32.mrb[6].mxu0 }
 0x652   : > { %v2456_v37 = vpop.f32.mrb[7].mxu0  ;;  %v1247_v38 = vsel %vm768_vm3, %v1243_v36, -inf }
 0x653   : > { %1248 = vmax.xlane.f32.xlu0 %v1247_v38  ;;  %v1689_v37 = vld [vmem:[%s3614_s9 + $0x10] sm:$0xff] }
 0x654   : > { %v1693_v38 = vld [vmem:[%s3614_s9 + $0x30] sm:$0xff] }
 0x669   : > { %1258 = vrot.lane.b32.xlu0 %v3045_v44, %s2756_s19 }
 0x66d   : > { %1409 = vrot.lane.b32.xlu0 %v3042_v43, %s2757_s23  ;;  %v682_v43 = vld [vmem:[%s3610_s5 + $0x40] sm:$0xff] }
 0x66e   : > { %v2563_v50 = vpack.c.bf16 %v683_v48, %v682_v43  ;;  %v1695_v48 = vld [vmem:[%s3614_s9 + $0x40] sm:$0xff] }
 0x66f   : > { %v2580_v51 = vpack.c.bf16 %v1699_v49, %v1695_v48  ;;  %v1740_v48 = vld [vmem:[%s3614_s9 + $0x1a8] sm:$0xff] }
 0x670   : > { %2564 = vmatpush3.bf16.msra.mxu0 %v2563_v50  ;;  %v1697_v50 = vld [vmem:[%s3614_s9 + $0x50] sm:$0xff] }
 0x671   : > { %2565 = vmatprep.subr.bf16.mxu0 %v2752_v6 }
 0x674   : > { %2567 = vmatpush3.bf16.msra.mxu0 %v2566_v52  ;;  %v1701_v52 = vld [vmem:[%s3614_s9 + $0x70] sm:$0xff] }
 0x675   : > { %2568 = vmatprep.subr.bf16.mxu0 %v2752_v6 }
 0x6e0   : > { %v1249_v39 = vpop.xlane.xlu0 %1248 }
 0x6e1   : > { %v1250_v40 = vsub.f32 %v1243_v36, %v1249_v39  ;;  %v1696_v39 = vld [vmem:[%s3614_s9 + $0x48] sm:$0xff] }
 0x6e3   : > { %v1251_v41 = vmul.f32 1.442695, %v1250_v40  ;;  %v2608_v40 = vpack.c.bf16 %v1693_v38, %v1689_v37  ;;  %v1734_v37 = vld [vmem:[%s3614_s9 + $0x178] sm:$0xff] }
 0x6e4   : > { %v1259_v45 = vpop.permute.xlu0 %1258 }
 0x6e5   : > { %2726 = vpow2.f32 %v1251_v41  ;;  %2458 = vmatpush3.msk.msra.mxu1 %vm439_vm0, %v1259_v45  ;;  %v1700_v41 = vld [vmem:[%s3614_s9 + $0x68] sm:$0xff]  ;;  %v1698_v45 = vld [vmem:[%s3614_s9 + $0x58] sm:$0xff] }
 0x6e6   : > { %2473 = vmatprep.subr.mxu1 %v2753_v59 }
 0x6e8   : > { %v1410_v56 = vpop.permute.xlu0 %1409 }
 0x6ef   : > { %v2727_v46 = vpop.eup %2726 }
 0x6f0   : > { %v1253_v47 = vsel %vm768_vm3, %v2727_v46, 0.0 }
 0x6f1   : > { %1254 = vadd.xlane.f32.xlu1 %v1253_v47  ;;  %v2578_v47 = vpack.c.bf16 %v1700_v41, %v1696_v39  ;;  %v1731_v41 = vld [vmem:[%s3614_s9 + $0x160] sm:$0xff] }
 0x702   : > { %1411 = vrot.lane.b32.xlu1 %v3036_v42, %s2757_s23 }
 0x77e   : > { %v1255_v42 = vpop.xlane.xlu1 %1254 }
 0x77f   : > { %2728 = vrcp.f32 %v1255_v42  ;;  %v1704_v42 = vld [vmem:[%s3614_s9 + $0x88] sm:$0xff] }
 0x782   : > { %v1412_v55 = vpop.permute.xlu1 %1411 }
 0x789   : > { %v2729_v53 = vpop.eup %2728 }
 0x78a   : > { %v1257_v54 = vmul.f32 %v2729_v53, %v2727_v46  ;;  %v1702_v46 = vld [vmem:[%s3614_s9 + $0x78] sm:$0xff]  ;;  %v1708_v53 = vld [vmem:[%s3614_s9 + $0xa8] sm:$0xff] }
 0x78b   : > { %v2610_v43 = vpack.c.bf16 %v1702_v46, %v1698_v45  ;;  %v1729_v45 = vld [vmem:[%s3614_s9 + $0x150] sm:$0xff] }
 0x78c   : > { %2460 = vmatmul.mubr.msk.f32.vlgmr.msra.gmra.mrb[10].mxu1 %vm780_vm4, %v1257_v54  ;;  %v2612_v54 = vpack.c.bf16 %v1701_v52, %v1697_v50  ;;  %v1742_v52 = vld [vmem:[%s3614_s9 + $0x1b8] sm:$0xff] }
 0x78d   : > { %2474 = vmatpush3.xpose.msk.msra.mxu1 %vm691_vm2, %v1412_v55  ;;  %2475 = vmatprep.mubr.msk.f32.mxu1 %vm2754_vm1, %v2753_v59  ;;  %v2582_v55 = vpack.c.bf16 %v1708_v53, %v1704_v42  ;;  %v1735_v42 = vld [vmem:[%s3614_s9 + $0x180] sm:$0xff] }
 0x78e   : > { %2478 = vmatprep.subr.mxu1 %v2753_v59 }
 0x790   : > { %2476 = vmatmul.mubr.msk.f32.vlgmr.msra.gmra.mrb[12].mxu1 %vm691_vm2, %v1410_v56  ;;  %v1706_v56 = vld [vmem:[%s3614_s9 + $0x98] sm:$0xff] }
 0x791   : > { %2480 = vmatprep.mubr.msk.f32.mxu1 %vm2754_vm1, %v2753_v59 }
 0x85f   : > { %v1331_v57 = vpop.f32.mrb[10].mxu1 }
 0x860   : > { %v2461_v58 = vpop.f32.mrb[11].mxu1  ;;  %2471 = vmatmul.mubr.msk.f32.vlgmr.msra.gmra.mrb[8].mxu0 %vm691_vm2, %v1331_v57  ;;  %v1710_v57 = vld [vmem:[%s3614_s9 + $0xb8] sm:$0xff] }
 0x861   : > { %2491 = vmatprep.mubr.msk.f32.mxu0 %vm2754_vm1, %v2753_v59  ;;  %2570 = vmatpush3.bf16.msra.mxu0 %v2569_v9  ;;  %v1703_v58 = vld [vmem:[%s3614_s9 + $0x80] sm:$0xff]  ;;  %v1716_v9 = vld [vmem:[%s3614_s9 + $0xe8] sm:$0xff] }
 0x862   : > { %2571 = vmatprep.subr.bf16.mxu0 %v2752_v6 }
 0x863   : > { %v1483_v60 = vpop.f32.mrb[12].mxu1 }
 0x864   : > { %v2477_v61 = vpop.f32.mrb[13].mxu1  ;;  %v1487_v62 = vsel %vm768_vm3, %v1483_v60, -inf }
 0x865   : > { %1488 = vmax.xlane.f32.xlu0 %v1487_v62  ;;  %v1707_v61 = vld [vmem:[%s3614_s9 + $0xa0] sm:$0xff]  ;;  %v1705_v62 = vld [vmem:[%s3614_s9 + $0x90] sm:$0xff] }
 0x87b   : > { %1498 = vrot.lane.b32.xlu0 %v3045_v44, %s2757_s23  ;;  %v688_v44 = vld [vmem:[%s3610_s5 + $0x70] sm:$0xff] }
 0x87c   : > { %v2572_v11 = vpack.c.bf16 %v689_v10, %v688_v44  ;;  %v1712_v44 = vld [vmem:[%s3614_s9 + $0xc8] sm:$0xff]  ;;  %v1714_v10 = vld [vmem:[%s3614_s9 + $0xd8] sm:$0xff] }
 0x87e   : > { %2573 = vmatpush3.bf16.msra.mxu0 %v2572_v11  ;;  %v2586_v11 = vpack.c.bf16 %v1716_v9, %v1712_v44 }
 0x8f2   : > { %v1489_v63 = vpop.xlane.xlu0 %1488 }
 0x8f3   : > { %v1490_v1 = vsub.f32 %v1483_v60, %v1489_v63  ;;  %v2614_v60 = vpack.c.bf16 %v1710_v57, %v1706_v56  ;;  %v1709_v63 = vld [vmem:[%s3614_s9 + $0xb0] sm:$0xff] }
 0x8f4   : > { %v1741_v56 = vld [vmem:[%s3614_s9 + $0x1b0] sm:$0xff] }
 0x8f5   : > { %v1491_v2 = vmul.f32 1.442695, %v1490_v1  ;;  %v2584_v1 = vpack.c.bf16 %v1707_v61, %v1703_v58  ;;  %v1744_v58 = vld [vmem:[%s3614_s9 + $0x1c8] sm:$0xff]  ;;  %v1746_v61 = vld [vmem:[%s3614_s9 + $0x1d8] sm:$0xff] }
 0x8f6   : > { %v1499_v3 = vpop.permute.xlu0 %1498 }
 0x8f7   : > { %2730 = vpow2.f32 %v1491_v2  ;;  %2479 = vmatpush3.msk.msra.mxu1 %vm439_vm0, %v1499_v3  ;;  %v2616_v2 = vpack.c.bf16 %v1709_v63, %v1705_v62 }
 0x901   : > { %v2731_v4 = vpop.eup %2730 }
 0x902   : > { %v1493_v5 = vsel %vm768_vm3, %v2731_v4, 0.0 }
 0x903   : > { %1494 = vadd.xlane.f32.xlu1 %v1493_v5 }
 0x933   : > { %v1404_v12 = vpop.f32.mrb[8].mxu0 }
 0x934   : > { %v1408_v13 = vadd.f32 %v1404_v12, %v3118_v33  ;;  %v2472_v14 = vpop.f32.mrb[9].mxu0  ;;  %v1691_v33 = vld [vmem:[%s3614_s9 + $0x20] sm:$0xff]  ;;  %v1718_v12 = vld [vmem:[%s3614_s9 + $0xf8] sm:$0xff] }
 0x935   : > { %v2576_v36 = vpack.c.bf16 %v1691_v33, %v1687_v31  ;;  %v1715_v14 = vld [vmem:[%s3614_s9 + $0xe0] sm:$0xff]  ;;  %v1728_v31 = vld [vmem:[%s3614_s9 + $0x148] sm:$0xff] }
 0x990   : > { %v1495_v15 = vpop.xlane.xlu1 %1494 }
 0x991   : > { %2732 = vrcp.f32 %v1495_v15  ;;  %v2618_v15 = vpack.c.bf16 %v1718_v12, %v1714_v10  ;;  %v1967_v10 = vld [vmem:[%s3616_s11 + $0x80] sm:$0xff] }
 0x992   : > { %v1999_v12 = vld [vmem:[%s3616_s11 + $0x180] sm:$0xff] }
 0x99b   : > { %v2733_v16 = vpop.eup %2732 }
 0x99c   : > { %v1497_v17 = vmul.f32 %v2733_v16, %v2731_v4 }
 0x99e   : > { %2481 = vmatmul.mubr.msk.f32.vlgmr.msra.gmra.mrb[14].mxu1 %vm780_vm4, %v1497_v17  ;;  %v1713_v17 = vld [vmem:[%s3614_s9 + $0xd0] sm:$0xff] }
 0x99f   : > { %1837 = vmatprep.mubr.f32.mxu1 %v2753_v59 }
 0xa71   : > { %v1571_v18 = vpop.f32.mrb[14].mxu1 }
 0xa72   : > { %v2482_v19 = vpop.f32.mrb[15].mxu1  ;;  %2492 = vmatmul.mubr.msk.f32.vlgmr.msra.gmra.mrb[10].mxu0 %vm691_vm2, %v1571_v18  ;;  %v1717_v18 = vld [vmem:[%s3614_s9 + $0xf0] sm:$0xff] }
 0xa73   : > { %1908 = vmatprep.mubr.f32.mxu0 %v2753_v59  ;;  %v1692_v59 = vld [vmem:[%s3614_s9 + $0x28] sm:$0xff]  ;;  %v2620_v19 = vpack.c.bf16 %v1717_v18, %v1713_v17 }
 0xa74   : > { %v2574_v28 = vpack.c.bf16 %v1692_v59, %v1688_v26  ;;  %v1723_v26 = vld [vmem:[%s3614_s9 + $0x120] sm:$0xff] }
 0xa76   : > { %2575 = vmatprep.subr.bf16.mxu1 %v2574_v28  ;;  %v1721_v28 = vld [vmem:[%s3614_s9 + $0x110] sm:$0xff] }
 0xa77   : > { %2577 = vmatpush1.bf16.msra.mxu1 %v2576_v36  ;;  %v1730_v36 = vld [vmem:[%s3614_s9 + $0x158] sm:$0xff] }
 0xa78   : > { %2579 = vmatprep.subr.bf16.mxu1 %v2578_v47  ;;  %v2626_v39 = vpack.c.bf16 %v1734_v37, %v1730_v36  ;;  %v1733_v47 = vld [vmem:[%s3614_s9 + $0x170] sm:$0xff]  ;;  %v2002_v36 = vld [vmem:[%s3616_s11 + $0x198] sm:$0xff] }
 0xa79   : > { %v2628_v49 = vpack.c.bf16 %v1733_v47, %v1729_v45  ;;  %v1953_v37 = vld [vmem:[%s3616_s11 + $0x10] sm:$0xff]  ;;  %v1986_v45 = vld [vmem:[%s3616_s11 + $0x118] sm:$0xff]  ;;  %v1971_v47 = vld [vmem:[%s3616_s11 + $0xa0] sm:$0xff] }
 0xa7b   : > { %2581 = vmatpush1.bf16.msra.mxu1 %v2580_v51  ;;  %v1738_v51 = vld [vmem:[%s3614_s9 + $0x198] sm:$0xff] }
 0xa7c   : > { %2583 = vmatprep.subr.bf16.mxu1 %v2582_v55  ;;  %v2630_v53 = vpack.c.bf16 %v1742_v52, %v1738_v51  ;;  %v1737_v55 = vld [vmem:[%s3614_s9 + $0x190] sm:$0xff]  ;;  %v1955_v51 = vld [vmem:[%s3616_s11 + $0x20] sm:$0xff]  ;;  %v1956_v52 = vld [vmem:[%s3616_s11 + $0x28] sm:$0xff] }
 0xa7d   : > { %v2632_v62 = vpack.c.bf16 %v1741_v56, %v1737_v55  ;;  %v1988_v55 = vld [vmem:[%s3616_s11 + $0x128] sm:$0xff] }
 0xa7f   : > { %2585 = vmatpush1.bf16.msra.mxu1 %v2584_v1  ;;  %v1750_v1 = vld [vmem:[%s3614_s9 + $0x1f8] sm:$0xff] }
 0xa80   : > { %2587 = vmatprep.subr.bf16.mxu1 %v2586_v11  ;;  %v1968_v11 = vld [vmem:[%s3616_s11 + $0x88] sm:$0xff] }
 0xb45   : > { %v1644_v6 = vpop.f32.mrb[10].mxu0 }
 0xb46   : > { %v1648_v20 = vadd.f32 %v1644_v6, %v1408_v13  ;;  %v2493_v21 = vpop.f32.mrb[11].mxu0  ;;  %v1711_v13 = vld [vmem:[%s3614_s9 + $0xc0] sm:$0xff]  ;;  %v1720_v6 = vld [vmem:[%s3614_s9 + $0x108] sm:$0xff] }
 0xb47   : > { %v2588_v16 = vpack.c.bf16 %v1715_v14, %v1711_v13  ;;  %v1722_v21 = vld [vmem:[%s3614_s9 + $0x118] sm:$0xff]  ;;  %v2638_v13 = vpack.c.bf16 %v1968_v11, %v1967_v10  ;;  %v2000_v14 = vld [vmem:[%s3616_s11 + $0x188] sm:$0xff]  ;;  %v2007_v10 = vld [vmem:[%s3616_s11 + $0x1c0] sm:$0xff] }
 0xb48   : > { %v1649_v23 = vadd.f32 %v1648_v20, %v2844_v0  ;;  %v1694_v0 = vld [vmem:[%s3614_s9 + $0x38] sm:$0xff]  ;;  %v1724_v20 = vld [vmem:[%s3614_s9 + $0x128] sm:$0xff] }
 0xb49   : > { %v2606_v35 = vpack.c.bf16 %v1694_v0, %v1690_v27  ;;  %2589 = vmatpush1.bf16.msra.mxu1 %v2588_v16  ;;  %v1725_v0 = vld [vmem:[%s3614_s9 + $0x130] sm:$0xff]  ;;  %v2008_v11 = vld [vmem:[%s3616_s11 + $0x1c8] sm:$0xff] }
 0xb4a   : > { %v3182_v24 = vadd.f32 %v2246_v22, %v1649_v23  ;;  %v2590_v22 = vpack.c.bf16 %v1724_v20, %v1720_v6  ;;  %v1726_v23 = vld [vmem:[%s3614_s9 + $0x138] sm:$0xff]  ;;  %v2624_v33 = vpack.c.bf16 %v1725_v0, %v1721_v28  ;;  %v2247_v6 = vld [vmem:[%s3612_s7] ss:$0 sm:$0xff]  ;;  %v1969_v0 = vld [vmem:[%s3616_s11 + $0x90] sm:$0xff] }
 0xb4b   : > { %2607 = vmatprep.subr.bf16.mxu0 %v2606_v35  ;;  %v2622_v59 = vpack.c.bf16 %v1726_v23, %v1722_v21  ;;  %v1732_v35 = vld [vmem:[%s3614_s9 + $0x168] sm:$0xff]  ;;  %v1951_v20 = vld [vmem:[%s3616_s11] sm:$0xff] }
 0xb4c   : > { %v1660_v25 = vsel %vm439_vm0, %v3182_v24, 0.0  ;;  %2609 = vmatpush1.bf16.msra.mxu0 %v2608_v40  ;;  %2591 = vmatprep.subr.bf16.mxu1 %v2590_v22  ;;  %v2594_v38 = vpack.c.bf16 %v1732_v35, %v1728_v31  ;;  %v1727_v40 = vld [vmem:[%s3614_s9 + $0x140] sm:$0xff]  ;;  %v1952_v22 = vld [vmem:[%s3616_s11 + $0x8] sm:$0xff]  ;;  %v1970_v31 = vld [vmem:[%s3616_s11 + $0x98] sm:$0xff] }
 0xb4d   : > { %1661 = vadd.xlane.f32.xlu1 %v1660_v25  ;;  %2611 = vmatprep.subr.bf16.mxu0 %v2610_v43  ;;  %v1719_v25 = vld [vmem:[%s3614_s9 + $0x100] sm:$0xff]  ;;  %v2596_v46 = vpack.c.bf16 %v1731_v41, %v1727_v40  ;;  %v1736_v43 = vld [vmem:[%s3614_s9 + $0x188] sm:$0xff]  ;;  %v2642_v35 = vpack.c.bf16 %v1970_v31, %v1969_v0  ;;  %v1985_v41 = vld [vmem:[%s3616_s11 + $0x110] sm:$0xff] }
 0xb4e   : > { %v2592_v27 = vpack.c.bf16 %v1723_v26, %v1719_v25  ;;  %v2598_v50 = vpack.c.bf16 %v1740_v48, %v1736_v43  ;;  %v1983_v23 = vld [vmem:[%s3616_s11 + $0x100] sm:$0xff]  ;;  %v1984_v25 = vld [vmem:[%s3616_s11 + $0x108] sm:$0xff] }
 0xb4f   : > { %v2248_v26 = vld [vmem:[%s3613_s8] ss:$0 sm:$0xff]  ;;  %v2672_v28 = vpack.c.bf16 %v1984_v25, %v1983_v23  ;;  %v1972_v43 = vld [vmem:[%s3616_s11 + $0xa8] sm:$0xff]  ;;  %v2010_v23 = vld [vmem:[%s3616_s11 + $0x1d8] sm:$0xff] }
 0xb50   : > { %2613 = vmatpush1.bf16.msra.mxu0 %v2612_v54  ;;  %2593 = vmatpush1.bf16.msra.mxu1 %v2592_v27  ;;  %v1739_v54 = vld [vmem:[%s3614_s9 + $0x1a0] sm:$0xff]  ;;  %v2640_v27 = vpack.c.bf16 %v1952_v22, %v1951_v20  ;;  %v2009_v22 = vld [vmem:[%s3616_s11 + $0x1d0] sm:$0xff]  ;;  %v1980_v31 = vld [vmem:[%s3616_s11 + $0xe8] sm:$0xff] }
 0xb51   : > { %2615 = vmatprep.subr.bf16.mxu0 %v2614_v60  ;;  %2595 = vmatprep.subr.bf16.mxu1 %v2594_v38  ;;  %v2600_v57 = vpack.c.bf16 %v1739_v54, %v1735_v42  ;;  %v1748_v60 = vld [vmem:[%s3614_s9 + $0x1e8] sm:$0xff]  ;;  %v1954_v38 = vld [vmem:[%s3616_s11 + $0x18] sm:$0xff]  ;;  %v2003_v48 = vld [vmem:[%s3616_s11 + $0x1a0] sm:$0xff] }
 0xb52   : > { %v2602_v63 = vpack.c.bf16 %v1748_v60, %v1744_v58  ;;  %v2644_v40 = vpack.c.bf16 %v1954_v38, %v1953_v37  ;;  %v1987_v54 = vld [vmem:[%s3616_s11 + $0x120] sm:$0xff]  ;;  %v1974_v58 = vld [vmem:[%s3616_s11 + $0xb8] sm:$0xff]  ;;  %v2005_v60 = vld [vmem:[%s3616_s11 + $0x1b0] sm:$0xff] }
 0xb53   : > { %v2680_v56 = vpack.c.bf16 %v1988_v55, %v1987_v54  ;;  %v1961_v25 = vld [vmem:[%s3616_s11 + $0x50] sm:$0xff]  ;;  %v1979_v0 = vld [vmem:[%s3616_s11 + $0xe0] sm:$0xff]  ;;  %v2012_v37 = vld [vmem:[%s3616_s11 + $0x1e8] sm:$0xff] }
 0xb54   : > { %2617 = vmatpush1.bf16.msra.mxu0 %v2616_v2  ;;  %2597 = vmatpush1.bf16.msra.mxu1 %v2596_v46  ;;  %v1743_v2 = vld [vmem:[%s3614_s9 + $0x1c0] sm:$0xff]  ;;  %v2676_v46 = vpack.c.bf16 %v1986_v45, %v1985_v41  ;;  %v1996_v45 = vld [vmem:[%s3616_s11 + $0x168] sm:$0xff]  ;;  %v1997_v54 = vld [vmem:[%s3616_s11 + $0x170] sm:$0xff] }
 0xb55   : > { %2619 = vmatprep.subr.bf16.mxu0 %v2618_v15  ;;  %2599 = vmatprep.subr.bf16.mxu1 %v2598_v50  ;;  %v2670_v15 = vpack.c.bf16 %v2000_v14, %v1999_v12  ;;  %v2004_v50 = vld [vmem:[%s3616_s11 + $0x1a8] sm:$0xff]  ;;  %v1959_v14 = vld [vmem:[%s3616_s11 + $0x40] sm:$0xff]  ;;  %v1998_v55 = vld [vmem:[%s3616_s11 + $0x178] sm:$0xff] }
 0xb56   : > { %v2678_v42 = vpack.c.bf16 %v2004_v50, %v2003_v48  ;;  %v1963_v38 = vld [vmem:[%s3616_s11 + $0x60] sm:$0xff]  ;;  %v2014_v48 = vld [vmem:[%s3616_s11 + $0x1f8] sm:$0xff] }
 0xb57   : > { %v1995_v41 = vld [vmem:[%s3616_s11 + $0x160] sm:$0xff] }
 0xb58   : > { %2621 = vmatpush1.bf16.msra.mxu0 %v2620_v19  ;;  %2601 = vmatpush1.bf16.msra.mxu1 %v2600_v57  ;;  %v1973_v57 = vld [vmem:[%s3616_s11 + $0xb0] sm:$0xff]  ;;  %v2696_v50 = vpack.c.bf16 %v1996_v45, %v1995_v41 }
 0xb59   : > { %2623 = vmatprep.subr.bf16.mxu0 %v2622_v59  ;;  %2603 = vmatprep.subr.bf16.mxu1 %v2602_v63  ;;  %v1957_v63 = vld [vmem:[%s3616_s11 + $0x30] sm:$0xff] }
 0xb5c   : > { %2625 = vmatpush1.bf16.msra.mxu0 %v2624_v33  ;;  %v2001_v33 = vld [vmem:[%s3616_s11 + $0x190] sm:$0xff] }
 0xb5d   : > { %2627 = vmatprep.subr.bf16.mxu0 %v2626_v39  ;;  %v2674_v39 = vpack.c.bf16 %v2002_v36, %v2001_v33  ;;  %v2011_v33 = vld [vmem:[%s3616_s11 + $0x1e0] sm:$0xff]  ;;  %v2662_v36 = vpack.c.bf16 %v1980_v31, %v1979_v0 }
 0xb60   : > { %2629 = vmatpush1.bf16.msra.mxu0 %v2628_v49  ;;  %v2646_v49 = vpack.c.bf16 %v1972_v43, %v1971_v47  ;;  %v1982_v47 = vld [vmem:[%s3616_s11 + $0xf8] sm:$0xff]  ;;  %v2013_v43 = vld [vmem:[%s3616_s11 + $0x1f0] sm:$0xff] }
 0xb61   : > { %2631 = vmatprep.subr.bf16.mxu0 %v2630_v53  ;;  %v2648_v53 = vpack.c.bf16 %v1956_v52, %v1955_v51  ;;  %v1965_v52 = vld [vmem:[%s3616_s11 + $0x70] sm:$0xff] }
 0xb64   : > { %2633 = vmatpush1.bf16.msra.mxu0 %v2632_v62  ;;  %v2006_v62 = vld [vmem:[%s3616_s11 + $0x1b8] sm:$0xff] }
 0xbda   : > { %v1662_v3 = vpop.xlane.xlu1 %1661 }
 0xbdb   : > { %v1663_v4 = vmul.f32 0.0078125, %v1662_v3  ;;  %v1747_v3 = vld [vmem:[%s3614_s9 + $0x1e0] sm:$0xff] }
 0xbdc   : > { %v2604_v44 = vpack.c.bf16 %v1747_v3, %v1743_v2  ;;  %v2682_v2 = vpack.c.bf16 %v2006_v62, %v2005_v60  ;;  %v1767_v60 = vsub.s32 3, %v3022_v29 }
 0xbdd   : > { %v3259_v5 = vsub.f32 %v3182_v24, %v1663_v4  ;;  %v2634_v4 = vpack.c.bf16 %v1750_v1, %v1746_v61  ;;  %v2650_v61 = vpack.c.bf16 %v1974_v58, %v1973_v57  ;;  %v1958_v1 = vld [vmem:[%s3616_s11 + $0x38] sm:$0xff]  ;;  %v2700_v57 = vpack.c.bf16 %v1998_v55, %v1997_v54  ;;  %v1751_v58 = vld [vmem:[%s3615_s10] sm:$0xf] }
 0xbde   : > { %2605 = vmatpush1.bf16.msra.mxu1 %v2604_v44  ;;  %v2652_v3 = vpack.c.bf16 %v1958_v1, %v1957_v63  ;;  %v1764_v62 = vrot.slane %v1751_v58, %v528_v34  ;;  %v1760_v63 = vrot.slane %v1751_v58, %v524_v32  ;;  %v1768_v1 = vrot.slane %v1751_v58, %v1767_v60 }
 0xbdf   : > { %v1665_v7 = vmul.f32 %v3259_v5, %v3259_v5  ;;  %2635 = vmatprep.subr.bf16.mxu0 %v2634_v4  ;;  %2639 = vmatprep.subr.bf16.mxu1 %v2638_v13  ;;  %v1989_v4 = vld [vmem:[%s3616_s11 + $0x130] sm:$0xff]  ;;  %v2686_v13 = vpack.c.bf16 %v2008_v11, %v2007_v10 }
 0xbe1   : > { %v1666_v8 = vsel %vm439_vm0, %v1665_v7, 0.0  ;;  %v1745_v7 = vld [vmem:[%s3614_s9 + $0x1d0] sm:$0xff] }
 0xbe2   : > { %1667 = vadd.xlane.f32.xlu1 %v1666_v8  ;;  %v1749_v8 = vld [vmem:[%s3614_s9 + $0x1f0] sm:$0xff] }
 0xbe3   : > { %v2636_v9 = vpack.c.bf16 %v1749_v8, %v1745_v7  ;;  %v1990_v7 = vld [vmem:[%s3616_s11 + $0x138] sm:$0xff]  ;;  %v1975_v8 = vld [vmem:[%s3616_s11 + $0xc0] sm:$0xff] }
 0xbe4   : > { %v2684_v44 = vpack.c.bf16 %v1990_v7, %v1989_v4 }
 0xbe5   : > { %2637 = vmatpush1.bf16.msra.mxu0 %v2636_v9  ;;  %v1976_v9 = vld [vmem:[%s3616_s11 + $0xc8] sm:$0xff] }
 0xbe6   : > { %2671 = vmatprep.subr.bf16.mxu0 %v2670_v15  ;;  %v2654_v12 = vpack.c.bf16 %v1976_v9, %v1975_v8  ;;  %v1960_v15 = vld [vmem:[%s3616_s11 + $0x48] sm:$0xff] }
 0xc6f   : > { %v1668_v16 = vpop.xlane.xlu1 %1667 }
 0xc70   : > { %v1669_v17 = vmul.f32 0.0078125, %v1668_v16  ;;  %v1991_v16 = vld [vmem:[%s3616_s11 + $0x140] sm:$0xff] }
 0xc72   : > { %v1670_v18 = vadd.f32 1e-06, %v1669_v17  ;;  %v2656_v17 = vpack.c.bf16 %v1960_v15, %v1959_v14 }
 0xc74   : > { %2734 = vrsqrt.f32 %v1670_v18  ;;  %v1992_v18 = vld [vmem:[%s3616_s11 + $0x148] sm:$0xff] }
 0xc75   : > { %v2688_v20 = vpack.c.bf16 %v1992_v18, %v1991_v16 }
 0xc7e   : > { %v2735_v19 = vpop.eup %2734 }
 0xc7f   : > { %v1672_v21 = vmul.f32 %v2735_v19, %v3259_v5  ;;  %v1977_v19 = vld [vmem:[%s3616_s11 + $0xd0] sm:$0xff] }
 0xc81   : > { %v1679_v59 = vmul.f32 %v2247_v6, %v1672_v21  ;;  %v1978_v6 = vld [vmem:[%s3616_s11 + $0xd8] sm:$0xff] }
 0xc82   : > { %v2658_v21 = vpack.c.bf16 %v1978_v6, %v1977_v19 }
 0xc83   : > { %v1686_v5 = vadd.f32 %v2248_v26, %v1679_v59  ;;  %v2690_v26 = vpack.c.bf16 %v2010_v23, %v2009_v22  ;;  %v1962_v59 = vld [vmem:[%s3616_s11 + $0x58] sm:$0xff] }
 0xc85   : > { %1838 = vmatmul.mubr.f32.vlgmr.msra.gmra.mrb[16].mxu1 %v1686_v5  ;;  %1909 = vmatmul.mubr.f32.vlgmr.msra.gmra.mrb[12].mxu0 %v1686_v5  ;;  %v2660_v5 = vpack.c.bf16 %v1962_v59, %v1961_v25 }
 0xc86   : > { %2641 = vmatpush3.bf16.msra.mxu1 %v2640_v27  ;;  %2673 = vmatpush3.bf16.msra.mxu0 %v2672_v28  ;;  %v1993_v27 = vld [vmem:[%s3616_s11 + $0x150] sm:$0xff]  ;;  %v1994_v28 = vld [vmem:[%s3616_s11 + $0x158] sm:$0xff] }
 0xc87   : > { %2643 = vmatprep.subr.bf16.mxu1 %v2642_v35  ;;  %2675 = vmatprep.subr.bf16.mxu0 %v2674_v39  ;;  %v2692_v35 = vpack.c.bf16 %v1994_v28, %v1993_v27  ;;  %v1964_v39 = vld [vmem:[%s3616_s11 + $0x68] sm:$0xff] }
 0xc8a   : > { %2645 = vmatpush3.bf16.msra.mxu1 %v2644_v40  ;;  %2677 = vmatpush3.bf16.msra.mxu0 %v2676_v46  ;;  %v2694_v40 = vpack.c.bf16 %v2012_v37, %v2011_v33  ;;  %v1981_v46 = vld [vmem:[%s3616_s11 + $0xf0] sm:$0xff] }
 0xc8b   : > { %2647 = vmatprep.subr.bf16.mxu1 %v2646_v49  ;;  %2679 = vmatprep.subr.bf16.mxu0 %v2678_v42  ;;  %v2664_v49 = vpack.c.bf16 %v1964_v39, %v1963_v38  ;;  %v2666_v51 = vpack.c.bf16 %v1982_v47, %v1981_v46  ;;  %v1966_v42 = vld [vmem:[%s3616_s11 + $0x78] sm:$0xff] }
 0xc8e   : > { %2649 = vmatpush3.bf16.msra.mxu1 %v2648_v53  ;;  %2681 = vmatpush3.bf16.msra.mxu0 %v2680_v56  ;;  %v2698_v53 = vpack.c.bf16 %v2014_v48, %v2013_v43  ;;  %v2668_v56 = vpack.c.bf16 %v1966_v42, %v1965_v52  ;;  %v2249_v48 = vld [vmem:[%s3617_s12] ss:$0 sm:$0xff] }
 0xc8f   : > { %2651 = vmatprep.subr.bf16.mxu1 %v2650_v61  ;;  %2683 = vmatprep.subr.bf16.mxu0 %v2682_v2  ;;  %v1756_v61 = vrot.slane %v1751_v58, %v520_v30 }
 0xc92   : > { %2653 = vmatpush3.bf16.msra.mxu1 %v2652_v3  ;;  %2685 = vmatpush3.bf16.msra.mxu0 %v2684_v44 }
 0xc93   : > { %2655 = vmatprep.subr.bf16.mxu1 %v2654_v12  ;;  %2687 = vmatprep.subr.bf16.mxu0 %v2686_v13 }
 0xc96   : > { %2657 = vmatpush3.bf16.msra.mxu1 %v2656_v17  ;;  %2689 = vmatpush3.bf16.msra.mxu0 %v2688_v20 }
 0xc97   : > { %2659 = vmatprep.subr.bf16.mxu1 %v2658_v21  ;;  %2691 = vmatprep.subr.bf16.mxu0 %v2690_v26 }
 0xc9a   : > { %2661 = vmatpush3.bf16.msra.mxu1 %v2660_v5  ;;  %2693 = vmatpush3.bf16.msra.mxu0 %v2692_v35 }
 0xc9b   : > { %2663 = vmatprep.subr.bf16.mxu1 %v2662_v36  ;;  %2695 = vmatprep.subr.bf16.mxu0 %v2694_v40 }
 0xc9e   : > { %2665 = vmatpush3.bf16.msra.mxu1 %v2664_v49  ;;  %2697 = vmatpush3.bf16.msra.mxu0 %v2696_v50 }
 0xc9f   : > { %2667 = vmatprep.subr.bf16.mxu1 %v2666_v51  ;;  %2699 = vmatprep.subr.bf16.mxu0 %v2698_v53 }
 0xca2   : > { %2669 = vmatpush3.bf16.msra.mxu1 %v2668_v56  ;;  %2701 = vmatpush3.bf16.msra.mxu0 %v2700_v57 }
 0xd58   : > { %v1839_v2 = vpop.f32.mrb[16].mxu1  ;;  %v1910_v3 = vpop.f32.mrb[12].mxu0 }
 0xd59   : > { %v1840_v4 = vadd.f32 %v1839_v2, %v1756_v61  ;;  %v1911_v7 = vadd.f32 %v1910_v3, %v1764_v62  ;;  %v1841_v8 = vpop.f32.mrb[17].mxu1  ;;  %v1912_v44 = vpop.f32.mrb[13].mxu0 }
 0xd5a   : > { %v1842_v9 = vadd.f32 %v1841_v8, %v1760_v63  ;;  %v1913_v10 = vadd.f32 %v1912_v44, %v1768_v1 }
 0xd5b   : > { %v1919_v11 = vmul.f32 0.044715, %v1840_v4  ;;  %v1921_v12 = vmul.f32 0.044715, %v1911_v7  ;;  %v1915_v37 = vmul.f32 0.5, %v1840_v4  ;;  %v1917_v39 = vmul.f32 0.5, %v1911_v7 }
 0xd5c   : > { %v1920_v13 = vmul.f32 0.044715, %v1842_v9  ;;  %v1922_v14 = vmul.f32 0.044715, %v1913_v10  ;;  %v1916_v0 = vmul.f32 0.5, %v1842_v9  ;;  %v1918_v35 = vmul.f32 0.5, %v1913_v10 }
 0xd5d   : > { %v1923_v30 = vmul.f32 %v1919_v11, %v1840_v4  ;;  %v1925_v15 = vmul.f32 %v1921_v12, %v1911_v7 }
 0xd5e   : > { %v1924_v16 = vmul.f32 %v1920_v13, %v1842_v9  ;;  %v1926_v34 = vmul.f32 %v1922_v14, %v1913_v10 }
 0xd5f   : > { %v1927_v17 = vmul.f32 %v1923_v30, %v1840_v4  ;;  %v1929_v29 = vmul.f32 %v1925_v15, %v1911_v7 }
 0xd60   : > { %v1928_v32 = vmul.f32 %v1924_v16, %v1842_v9  ;;  %v1930_v18 = vmul.f32 %v1926_v34, %v1913_v10 }
 0xd61   : > { %v1931_v19 = vadd.f32 %v1927_v17, %v1840_v4  ;;  %v1933_v6 = vadd.f32 %v1929_v29, %v1911_v7 }
 0xd62   : > { %v1932_v20 = vadd.f32 %v1928_v32, %v1842_v9  ;;  %v1934_v21 = vadd.f32 %v1930_v18, %v1913_v10 }
 0xd63   : > { %v1935_v22 = vmul.f32 0.7978846, %v1931_v19  ;;  %v1937_v26 = vmul.f32 0.7978846, %v1933_v6 }
 0xd64   : > { %v1936_v23 = vmul.f32 0.7978846, %v1932_v20  ;;  %v1938_v25 = vmul.f32 0.7978846, %v1934_v21 }
 0xd65   : > { %2736 = vtanh.f32 %v1935_v22 }
 0xd66   : > { %2738 = vtanh.f32 %v1936_v23 }
 0xd67   : > { %2740 = vtanh.f32 %v1938_v25 }
 0xd68   : > { %2742 = vtanh.f32 %v1937_v26 }
 0xd6f   : > { %v2737_v59 = vpop.eup %2736 }
 0xd70   : > { %v2739_v27 = vpop.eup %2738  ;;  %v1943_v28 = vadd.f32 1.0, %v2737_v59 }
 0xd71   : > { %v2741_v5 = vpop.eup %2740  ;;  %v1944_v31 = vadd.f32 1.0, %v2739_v27 }
 0xd72   : > { %v2743_v33 = vpop.eup %2742  ;;  %v1946_v36 = vadd.f32 1.0, %v2741_v5  ;;  %v1947_v45 = vmul.f32 %v1943_v28, %v1915_v37 }
 0xd73   : > { %v1948_v38 = vmul.f32 %v1944_v31, %v1916_v0  ;;  %v1945_v40 = vadd.f32 1.0, %v2743_v33 }
 0xd74   : > { %v1950_v41 = vmul.f32 %v1946_v36, %v1918_v35 }
 0xd75   : > { %2086 = vmatprep.mubr.f32.mxu1 %v1948_v38  ;;  %v1949_v46 = vmul.f32 %v1945_v40, %v1917_v39 }
 0xd76   : > { %2156 = vmatprep.mubr.f32.mxu0 %v1950_v41  ;;  %2087 = vmatmul.mubr.f32.vlgmr.msra.gmra.mrb[18].mxu1 %v1947_v45 }
 0xd77   : > { %2157 = vmatmul.mubr.f32.vlgmr.msra.gmra.mrb[14].mxu0 %v1949_v46 }
 0xe49   : > { %v2337_v47 = vpop.f32.mrb[18].mxu1 }
 0xe4a   : > { %v2372_v43 = vpop.f32.mrb[14].mxu0  ;;  %v2338_v49 = vpop.f32.mrb[19].mxu1 }
 0xe4b   : > { %v2339_v50 = vadd.f32 %v2338_v49, %v2337_v47  ;;  %v2373_v51 = vpop.f32.mrb[15].mxu0 }
 0xe4c   : > { %v2374_v52 = vadd.f32 %v2373_v51, %v2372_v43 }
 0xe4d   : > { %v2089_v42 = vadd.f32 %v2339_v50, %v2249_v48 }
 0xe4f   : > { %v2159_v53 = vadd.f32 %v2374_v52, %v2089_v42 }
 0xe51   : > { %v2162_v54 = vadd.f32 %v2159_v53, %v3182_v24 }
 0xe53   : > { %2163 = vst [vmem:[%s435_s30] sm:$0x1f] %v2162_v54 }
 0xe54 PF: > { %s23_s25 = sadd.s32 1, %s2750_s25  }
 0xe55   : > { %p20_p4 = scmp.ge.s32.totalorder %s23_s25, 4  }
 0xe57   :  { %22 = sbr.rel (!%p20_p4) target bundleno = 1 (0x1), region = 102 }

</bundles_post_ra>
